<compile_context>
chip_gen: v7x
topology: tpu7x:2x2x1
jax: 0.10.0
libtpu: 0.0.40
codegen_flags: <defaults>
</compile_context>

<pallas_src>
import functools

import jax
import jax.numpy as jnp
from jax.experimental import pallas as pl
from jax.experimental.pallas import tpu as pltpu


def _round_up(n, m):
    return (n + m - 1) // m * m


# ------------------------------ fused multi-field kernel ------------------------------

def _make_kernel(field_cfgs, C, T, T_pad, NC_pad, OFF, Lmax):
    """One grid step = (batch b, field f).  Per field (static under pl.when):
       MaxPool1d(2P+1, s=1, pad=P) -> Conv1d(C,C,3,dil=d1,'same')
       -> Conv1d(C,C,3,dil=d2,'same') -> Conv1d(2*rf*C, NC, 1) over length-2*rf
       context windows + ReLU.

       Layout: channels on sublanes, padded time on lanes.  Boundary handling is an
       explicitly initialised halo in `padbuf` plus one lane mask per stage (only when
       T < T_pad)."""
    need_mask = T != T_pad

    def kernel(x_ref, w1_ref, b1_ref, w2_ref, b2_ref, wc_ref, bc_ref,
               logits_ref, scores_ref, padbuf, stackbuf, segbuf):
        f = pl.program_id(1)
        x = x_ref[0].astype(jnp.float32)                     # [C, T_pad] (bf16 in HBM)

        if need_mask:                                        # hoisted: one mask, reused
            lane = jax.lax.broadcasted_iota(jnp.int32, (1, T_pad), 1)
            valid = lane < T                                 # [1, T_pad]
        else:
            valid = None

        def mask(v, fill):
            return v if valid is None else jnp.where(valid, v, fill)

        def run_field(P, d1, d2, rf):
            # ---- MaxPool1d(2P+1, stride 1, padding P) with -inf padding ----
            if P > 0:
                ninf = jnp.full((C, OFF), -jnp.inf, jnp.float32)
                padbuf[:, :OFF] = ninf
                padbuf[:, OFF + T_pad:] = ninf
                padbuf[:, OFF:OFF + T_pad] = mask(x, float("-inf"))
                y = padbuf[:, OFF:OFF + T_pad]
                for j in range(1, P + 1):
                    y = jnp.maximum(y, padbuf[:, OFF + j:OFF + j + T_pad])
                    y = jnp.maximum(y, padbuf[:, OFF - j:OFF - j + T_pad])
            else:
                y = x

            # halo -> 0 for conv / classifier stages (stays 0 from here on)
            zhalo = jnp.zeros((C, OFF), jnp.float32)
            padbuf[:, :OFF] = zhalo
            padbuf[:, OFF + T_pad:] = zhalo

            # ---- dilated 3-tap conv == ONE bf16 MXU matmul (taps K-stacked, K=3C) ----
            def dconv(inp, w2d_ref, b_ref, d):
                padbuf[:, OFF:OFF + T_pad] = inp
                stackbuf[C:2 * C, :] = inp                                     # center
                stackbuf[0:C, :] = padbuf[:, OFF - d:OFF - d + T_pad]          # tap -d
                stackbuf[2 * C:3 * C, :] = padbuf[:, OFF + d:OFF + d + T_pad]  # tap +d
                out = jnp.dot(w2d_ref[0], stackbuf[...].astype(jnp.bfloat16),
                              preferred_element_type=jnp.float32)
                return out + b_ref[0]

            y0 = mask(y, 0.0)                                # zero beyond T (same-pad)
            h = dconv(y0, w1_ref, b1_ref, d1)                # [C, T_pad] f32
            h0 = mask(h, 0.0)
            logits = dconv(h0, w2_ref, b2_ref, d2)           # [C, T_pad] f32
            logits_ref[0, 0] = logits

            # ---- classifier: K-stacked [NC_pad, 2*rf*C] @ [2*rf*C, T_pad] matmul ----
            padbuf[:, OFF:OFF + T_pad] = mask(logits, 0.0)
            for o in range(2 * rf):
                s = o - (rf - 1)                             # window [t-(rf-1), t+rf]
                segbuf[o * C:(o + 1) * C, :] = padbuf[:, OFF + s:OFF + s + T_pad]
            L = 2 * rf * C
            sc = jnp.dot(wc_ref[0, :, :L], segbuf[:L, :].astype(jnp.bfloat16),
                         preferred_element_type=jnp.float32)
            scores_ref[0, 0] = jnp.maximum(sc + bc_ref[0], 0.0)

        for idx, (P, d1, d2, rf) in enumerate(field_cfgs):
            @pl.when(f == idx)
            def _(P=P, d1=d1, d2=d2, rf=rf):
                run_field(P, d1, d2, rf)

    return kernel


def spn_compute(x, params, receptive_fields):
    """Fused Pallas forward of all conv-nets + classifiers.
       Returns (logits [F,B,T,D], scores [F,B,T,NC]) before proposal filtering."""
    B, T, D = x.shape
    F = len(receptive_fields)
    NC = params["clf"][0]["w"].shape[1]
    T_pad = _round_up(T, 128)
    NC_pad = _round_up(max(NC, 8), 8)
    rf_max = max(receptive_fields)
    Lmax = 2 * rf_max * D
    OFF = 128                                   # 128-aligned halo for shifted windows

    field_cfgs = []
    w1l, b1l, w2l, b2l, wcl, bcl = [], [], [], [], [], []
    for i, rf in enumerate(receptive_fields):
        P = rf // 6
        d1 = rf // 6 * 2 + 1
        d2 = rf // 6 * 2 * 2 + 1
        assert max(P, d1, d2, rf) <= OFF, "halo too small for this receptive field"
        field_cfgs.append((P, d1, d2, rf))
        pc, pcl = params["conv"][i], params["clf"][i]
        # conv weight [3(tap), C_out, C_in] -> K-stacked [C_out, 3*C_in] (taps -d,0,+d)
        w1l.append(jnp.transpose(pc["w1"], (1, 0, 2)).reshape(D, 3 * D))
        w2l.append(jnp.transpose(pc["w2"], (1, 0, 2)).reshape(D, 3 * D))
        b1l.append(pc["b1"].reshape(D, 1))
        b2l.append(pc["b2"].reshape(D, 1))
        # classifier weight [L, NC] -> [NC_pad, Lmax] (zero-padded, 2D K-stacked)
        wc = pcl["w"].T                                      # [NC, L]
        wcl.append(jnp.pad(wc, ((0, NC_pad - NC), (0, Lmax - wc.shape[1]))))
        bcl.append(jnp.pad(pcl["b"].reshape(NC, 1), ((0, NC_pad - NC), (0, 0))))

    w1_all = jnp.stack(w1l).astype(jnp.bfloat16)             # [F, D, 3D]
    w2_all = jnp.stack(w2l).astype(jnp.bfloat16)
    b1_all = jnp.stack(b1l).astype(jnp.float32)              # [F, D, 1]
    b2_all = jnp.stack(b2l).astype(jnp.float32)
    wc_all = jnp.stack(wcl).astype(jnp.bfloat16)             # [F, NC_pad, Lmax]
    bc_all = jnp.stack(bcl).astype(jnp.float32)              # [F, NC_pad, 1]

    # x: [B,T,D] -> [B, D, T_pad] bf16 (time on lanes, zero-padded to lane-dense 128)
    xb = jnp.transpose(x, (0, 2, 1)).astype(jnp.bfloat16)
    if T_pad != T:
        xb = jnp.pad(xb, ((0, 0), (0, 0), (0, T_pad - T)))

    kernel = _make_kernel(tuple(field_cfgs), D, T, T_pad, NC_pad, OFF, Lmax)
    logits4, scores4 = pl.pallas_call(
        kernel,
        out_shape=(jax.ShapeDtypeStruct((F, B, D, T_pad), jnp.float32),
                   jax.ShapeDtypeStruct((F, B, NC_pad, T_pad), jnp.float32)),
        grid=(B, F),                                   # field innermost: x stays resident
        in_specs=[
            pl.BlockSpec((1, D, T_pad), lambda b, f: (b, 0, 0)),         # x (bf16)
            pl.BlockSpec((1, D, 3 * D), lambda b, f: (f, 0, 0)),         # conv1 W (bf16)
            pl.BlockSpec((1, D, 1), lambda b, f: (f, 0, 0)),             # conv1 b
            pl.BlockSpec((1, D, 3 * D), lambda b, f: (f, 0, 0)),         # conv2 W (bf16)
            pl.BlockSpec((1, D, 1), lambda b, f: (f, 0, 0)),             # conv2 b
            pl.BlockSpec((1, NC_pad, Lmax), lambda b, f: (f, 0, 0)),     # clf W (bf16)
            pl.BlockSpec((1, NC_pad, 1), lambda b, f: (f, 0, 0)),        # clf b
        ],
        out_specs=(pl.BlockSpec((1, 1, D, T_pad), lambda b, f: (f, b, 0, 0)),
                   pl.BlockSpec((1, 1, NC_pad, T_pad), lambda b, f: (f, b, 0, 0))),
        scratch_shapes=[
            pltpu.VMEM((D, T_pad + 2 * OFF), jnp.float32),   # padded window buffer
            pltpu.VMEM((3 * D, T_pad), jnp.float32),         # conv K-stacked taps
            pltpu.VMEM((Lmax, T_pad), jnp.float32),          # classifier K-stacked segs
        ],
        compiler_params=pltpu.CompilerParams(
            dimension_semantics=("parallel", "arbitrary"),
            vmem_limit_bytes=48 * 1024 * 1024,
        ),
    )(xb, w1_all, b1_all, w2_all, b2_all, wc_all, bc_all)

    logits = jnp.transpose(logits4[:, :, :, :T], (0, 1, 3, 2))       # [F,B,T,D]
    scores = jnp.transpose(scores4[:, :, :NC, :T], (0, 1, 3, 2))     # [F,B,T,NC]
    return logits, scores


# ------------------------------ plain-JAX glue ----------------------------------------

def _gen_anchors(batch, time, anchor_sizes):
    a = anchor_sizes.astype(jnp.float32)
    start_off = (jnp.ceil(a / 2.0) - 1.0).astype(jnp.int32)      # [F]
    end_off = jnp.floor(a / 2.0).astype(jnp.int32)               # [F]
    t = jnp.arange(time, dtype=jnp.int32)
    starts = t[None, :] - start_off[:, None]                     # [F, T]
    ends = t[None, :] + end_off[:, None]                         # [F, T]
    anchors = jnp.stack([starts, ends], axis=-1)                 # [F, T, 2]
    F = anchor_sizes.shape[0]
    return jnp.broadcast_to(anchors[:, None], (F, batch, time, 2))


def _filter_proposals(anchors, context_anchors, scores, k):
    # keep k lowest- and k highest-actioness proposals (background first, then action),
    # each ordered by descending actioness -- matches the argsort-based PyTorch code.
    # NOTE: with tied actioness values the selection order may differ from torch.argsort.
    actioness = jnp.sum(scores, axis=3)                          # [F, B, T]
    _, top_idx = jax.lax.top_k(actioness, k)                     # descending actioness
    _, bot_idx = jax.lax.top_k(-actioness, k)                    # ascending actioness
    bot_idx = bot_idx[..., ::-1]                                 # -> descending actioness
    idx = jnp.concatenate([bot_idx, top_idx], axis=2)            # [F, B, 2k]
    fa = jnp.take_along_axis(anchors, idx[..., None], axis=2)
    fc = jnp.take_along_axis(context_anchors, idx[..., None], axis=2)
    fs = jnp.take_along_axis(scores, idx[..., None], axis=2)
    return fa, fc, fs


def spn_forward(x, params, receptive_fields, num_classes):
    B, T, D = x.shape
    rf = jnp.array(receptive_fields, dtype=jnp.int32)
    anchors = _gen_anchors(B, T, rf)
    context_anchors = _gen_anchors(B, T, rf * 2)
    k = T // 4

    logits, scores_full = spn_compute(x, params, receptive_fields)
    f_anchors, f_ctx, f_scores = _filter_proposals(anchors, context_anchors,
                                                   scores_full, k)
    labels = None
    contrast_pairs = None
    # TODO(synk): training-only branches (video_labels, segment_mining / contrast_pairs)
    # are not implemented -- this is the eval-mode forward (labels/contrast_pairs = None).
    return f_scores, labels, f_anchors, f_ctx, logits, contrast_pairs


# ------------------------------ params & references -----------------------------------

def init_params(key, receptive_fields, D, NC):
    params = {"conv": [], "clf": []}
    for size in receptive_fields:
        key, k1, k2, k3, k4, k5, k6 = jax.random.split(key, 7)
        params["conv"].append({
            # conv weights stored as [3(tap), C_out, C_in]
            "w1": 0.2 * jax.random.normal(k1, (3, D, D), jnp.float32),
            "b1": 0.1 * jax.random.normal(k2, (D, 1), jnp.float32),
            "w2": 0.2 * jax.random.normal(k3, (3, D, D), jnp.float32),
            "b2": 0.1 * jax.random.normal(k4, (D, 1), jnp.float32),
        })
        L = 2 * size * D
        params["clf"].append({
            # Conv1d(L, NC, 1) weight stored transposed as [L, NC]
            "w": 0.05 * jax.random.normal(k5, (L, NC), jnp.float32),
            "b": 0.1 * jax.random.normal(k6, (1, NC), jnp.float32),
        })
    return params


def _ref_compute(x, params, receptive_fields, quantized=False):
    """Pure-JAX reference of the pre-filter forward (mirrors PyTorch).
       quantized=True value-quantizes at exactly the kernel's bf16 cast points
       (x on input, conv/classifier matmul operands), keeping f32 accumulation."""
    def q(a):
        return a.astype(jnp.bfloat16).astype(jnp.float32) if quantized else a

    B, T, D = x.shape
    x_bct = q(jnp.transpose(x, (0, 2, 1)).astype(jnp.float32))
    logits_list, scores_list = [], []
    for i, rf in enumerate(receptive_fields):
        pc = params["conv"][i]
        P, d1, d2 = rf // 6, rf // 6 * 2 + 1, rf // 6 * 2 * 2 + 1

        if P > 0:
            xp = jnp.pad(x_bct, ((0, 0), (0, 0), (P, P)), constant_values=-jnp.inf)
            y = xp[:, :, 0:T]
            for j in range(1, 2 * P + 1):
                y = jnp.maximum(y, xp[:, :, j:j + T])
        else:
            y = x_bct

        def dconv(inp, w, b, d):
            ip = jnp.pad(q(inp), ((0, 0), (0, 0), (d, d)))
            acc = jnp.zeros((B, D, T), jnp.float32)
            for kk in range(3):
                acc = acc + jnp.einsum("oc,bct->bot", q(w[kk]),
                                       ip[:, :, kk * d:kk * d + T],
                                       preferred_element_type=jnp.float32)
            return acc + b[None, :, :]

        h = dconv(y, pc["w1"], pc["b1"], d1)
        lg_bct = dconv(h, pc["w2"], pc["b2"], d2)
        lg = jnp.transpose(lg_bct, (0, 2, 1))                    # [B, T, D]

        padded = jnp.pad(q(lg), ((0, 0), (rf, rf), (0, 0)))
        starts = jnp.arange(T) - (rf - 1) + rf
        idx = starts[:, None] + jnp.arange(2 * rf)               # [T, 2rf]
        seg = padded[:, idx, :].reshape(B, T, 2 * rf * D)
        cw, cb = params["clf"][i]["w"], params["clf"][i]["b"]
        sc = jnp.einsum("btl,lc->btc", seg, q(cw),
                        preferred_element_type=jnp.float32) + cb
        logits_list.append(lg)
        scores_list.append(jnp.maximum(sc, 0.0))
    return jnp.stack(logits_list, 0), jnp.stack(scores_list, 0)


# ------------------------------ main ---------------------------------------------------

if __name__ == "__main__":
    B, T, D = 2, 32, 8
    receptive_fields = [6, 12]
    NC = 4

    key = jax.random.PRNGKey(0)
    kx, kp = jax.random.split(key)
    x = jax.random.normal(kx, (B, T, D), jnp.float32)
    params = init_params(kp, receptive_fields, D, NC)

    # full forward (filtered proposals), jitted
    fwd = jax.jit(functools.partial(spn_forward, receptive_fields=receptive_fields,
                                    num_classes=NC))
    scores, labels, anchors, ctx_anchors, logits, contrast = fwd(x, params)
    scores = jax.block_until_ready(scores)
    logits = jax.block_until_ready(logits)

    # correctness: pre-filter logits / scores against pure-JAX references
    kern_logits, kern_scores = spn_compute(x, params, receptive_fields)
    kern_logits = jax.block_until_ready(kern_logits)
    kern_scores = jax.block_until_ready(kern_scores)

    # (a) tight structural check vs a reference quantized at the kernel's cast points
    q_logits, q_scores = _ref_compute(x, params, receptive_fields, quantized=True)
    assert jnp.allclose(q_logits, kern_logits, atol=2e-2, rtol=2e-2), "logits mismatch (bf16 ref)"
    assert jnp.allclose(q_scores, kern_scores, atol=2e-2, rtol=2e-2), "scores mismatch (bf16 ref)"

    # (b) loose semantic check vs the pure-f32 reference (covers bf16 matmul rounding)
    r_logits, r_scores = _ref_compute(x, params, receptive_fields, quantized=False)
    assert jnp.allclose(r_logits, kern_logits, atol=1.5e-1, rtol=5e-2), "logits mismatch (f32 ref)"
    assert jnp.allclose(r_scores, kern_scores, atol=2e-1, rtol=5e-2), "scores mismatch (f32 ref)"

    k = T // 4
    F = len(receptive_fields)
    assert scores.shape == (F, B, 2 * k, NC)
    assert anchors.shape == (F, B, 2 * k, 2)
    assert ctx_anchors.shape == (F, B, 2 * k, 2)
    assert logits.shape == (F, B, T, D)
    assert bool(jnp.all(jnp.isfinite(scores)))
    assert bool(jnp.all(jnp.isfinite(logits)))
    assert labels is None and contrast is None

    print("KERNEL_OK")
</pallas_src>

<mosaic_0001>
module attributes {stable_mosaic.version = 11 : i64} {
  func.func @kernel(%arg0: i32, %arg1: i32, %arg2: memref<1x8x128xbf16, #tpu.memory_space<vmem>>, %arg3: memref<1x8x24xbf16, #tpu.memory_space<vmem>>, %arg4: memref<1x8x1xf32, #tpu.memory_space<vmem>>, %arg5: memref<1x8x24xbf16, #tpu.memory_space<vmem>>, %arg6: memref<1x8x1xf32, #tpu.memory_space<vmem>>, %arg7: memref<1x8x192xbf16, #tpu.memory_space<vmem>>, %arg8: memref<1x8x1xf32, #tpu.memory_space<vmem>>, %arg9: memref<1x1x8x128xf32, #tpu.memory_space<vmem>>, %arg10: memref<1x1x8x128xf32, #tpu.memory_space<vmem>>, %arg11: memref<8x384xf32, #tpu.memory_space<vmem>>, %arg12: memref<24x128xf32, #tpu.memory_space<vmem>>, %arg13: memref<192x128xf32, #tpu.memory_space<vmem>>) attributes {dimension_semantics = [#tpu.dimension_semantics<parallel>, #tpu.dimension_semantics<arbitrary>], iteration_bounds = array<i64: 2, 2>, scalar_prefetch = 0 : i64, scratch_operands = 3 : i64, tpu.core_type = #tpu.core_type<tc>, window_params = [{transform_indices = @transform_0, window_bounds = array<i64: 1, 8, 128>}, {transform_indices = @transform_1, window_bounds = array<i64: 1, 8, 24>}, {transform_indices = @transform_2, window_bounds = array<i64: 1, 8, 1>}, {transform_indices = @transform_3, window_bounds = array<i64: 1, 8, 24>}, {transform_indices = @transform_4, window_bounds = array<i64: 1, 8, 1>}, {transform_indices = @transform_5, window_bounds = array<i64: 1, 8, 192>}, {transform_indices = @transform_6, window_bounds = array<i64: 1, 8, 1>}, {transform_indices = @transform_7, window_bounds = array<i64: 1, 1, 8, 128>}, {transform_indices = @transform_8, window_bounds = array<i64: 1, 1, 8, 128>}]} {
    %c0 = arith.constant 0 : index
    %c0_0 = arith.constant 0 : index
    %c0_1 = arith.constant 0 : index
    %0 = vector.load %arg2[%c0, %c0_0, %c0_1] : memref<1x8x128xbf16, #tpu.memory_space<vmem>>, vector<1x8x128xbf16>
    %1 = vector.shape_cast %0 : vector<1x8x128xbf16> to vector<8x128xbf16>
    %2 = arith.extf %1 : vector<8x128xbf16> to vector<8x128xf32>
    %3 = tpu.iota {dimensions = array<i32: 1>} : vector<1x128xi32>
    %c32_i32 = arith.constant 32 : i32
    %4 = vector.broadcast %c32_i32 : i32 to vector<1x128xi32>
    %5 = arith.cmpi slt, %3, %4 : vector<1x128xi32>
    %c0_i32 = arith.constant 0 : i32
    %6 = arith.cmpi eq, %arg1, %c0_i32 : i32
    %7 = arith.extui %6 : i1 to i32
    %c0_i32_2 = arith.constant 0 : i32
    %8 = arith.cmpi ne, %7, %c0_i32_2 : i32
    scf.if %8 {
      %cst = arith.constant 0xFF800000 : f32
      %12 = vector.broadcast %cst : f32 to vector<8x128xf32>
      %c0_4 = arith.constant 0 : index
      %c0_5 = arith.constant 0 : index
      %13 = vector.load %arg11[%c0_4, %c0_5] : memref<8x384xf32, #tpu.memory_space<vmem>>, vector<8x128xf32>
      tpu.vector_store %arg11[%c0_4, %c0_5], %12 {strides = array<i32>} : memref<8x384xf32, #tpu.memory_space<vmem>>, vector<8x128xf32>,
      %c0_6 = arith.constant 0 : index
      %c256 = arith.constant 256 : index
      %14 = vector.load %arg11[%c0_6, %c256] : memref<8x384xf32, #tpu.memory_space<vmem>>, vector<8x128xf32>
      tpu.vector_store %arg11[%c0_6, %c256], %12 {strides = array<i32>} : memref<8x384xf32, #tpu.memory_space<vmem>>, vector<8x128xf32>,
      %cst_7 = arith.constant 0xFF800000 : f32
      %15 = vector.shape_cast %5 : vector<1x128xi1> to vector<1x128xi1>
      %16 = vector.broadcast %15 : vector<1x128xi1> to vector<8x128xi1>
      %17 = vector.broadcast %cst_7 : f32 to vector<8x128xf32>
      %18 = arith.select %16, %2, %17 : vector<8x128xi1>, vector<8x128xf32>
      %c0_8 = arith.constant 0 : index
      %c128 = arith.constant 128 : index
      %19 = vector.load %arg11[%c0_8, %c128] : memref<8x384xf32, #tpu.memory_space<vmem>>, vector<8x128xf32>
      tpu.vector_store %arg11[%c0_8, %c128], %18 {strides = array<i32>} : memref<8x384xf32, #tpu.memory_space<vmem>>, vector<8x128xf32>,
      %c0_9 = arith.constant 0 : index
      %c128_10 = arith.constant 128 : index
      %20 = vector.load %arg11[%c0_9, %c128_10] : memref<8x384xf32, #tpu.memory_space<vmem>>, vector<8x128xf32>
      %c0_11 = arith.constant 0 : index
      %c129 = arith.constant 129 : index
      %21 = vector.load %arg11[%c0_11, %c129] : memref<8x384xf32, #tpu.memory_space<vmem>>, vector<8x128xf32>
      %22 = arith.maximumf %20, %21 : vector<8x128xf32>
      %c0_12 = arith.constant 0 : index
      %c127 = arith.constant 127 : index
      %23 = vector.load %arg11[%c0_12, %c127] : memref<8x384xf32, #tpu.memory_space<vmem>>, vector<8x128xf32>
      %24 = arith.maximumf %22, %23 : vector<8x128xf32>
      %cst_13 = arith.constant 0.000000e+00 : f32
      %25 = vector.broadcast %cst_13 : f32 to vector<8x128xf32>
      %c0_14 = arith.constant 0 : index
      %c0_15 = arith.constant 0 : index
      %26 = vector.load %arg11[%c0_14, %c0_15] : memref<8x384xf32, #tpu.memory_space<vmem>>, vector<8x128xf32>
      tpu.vector_store %arg11[%c0_14, %c0_15], %25 {strides = array<i32>} : memref<8x384xf32, #tpu.memory_space<vmem>>, vector<8x128xf32>,
      %c0_16 = arith.constant 0 : index
      %c256_17 = arith.constant 256 : index
      %27 = vector.load %arg11[%c0_16, %c256_17] : memref<8x384xf32, #tpu.memory_space<vmem>>, vector<8x128xf32>
      tpu.vector_store %arg11[%c0_16, %c256_17], %25 {strides = array<i32>} : memref<8x384xf32, #tpu.memory_space<vmem>>, vector<8x128xf32>,
      %cst_18 = arith.constant 0.000000e+00 : f32
      %28 = vector.shape_cast %5 : vector<1x128xi1> to vector<1x128xi1>
      %29 = vector.broadcast %28 : vector<1x128xi1> to vector<8x128xi1>
      %30 = vector.broadcast %cst_18 : f32 to vector<8x128xf32>
      %31 = arith.select %29, %24, %30 : vector<8x128xi1>, vector<8x128xf32>
      %c0_19 = arith.constant 0 : index
      %c128_20 = arith.constant 128 : index
      %32 = vector.load %arg11[%c0_19, %c128_20] : memref<8x384xf32, #tpu.memory_space<vmem>>, vector<8x128xf32>
      tpu.vector_store %arg11[%c0_19, %c128_20], %31 {strides = array<i32>} : memref<8x384xf32, #tpu.memory_space<vmem>>, vector<8x128xf32>,
      %c8 = arith.constant 8 : index
      %c0_21 = arith.constant 0 : index
      %33 = vector.load %arg12[%c8, %c0_21] : memref<24x128xf32, #tpu.memory_space<vmem>>, vector<8x128xf32>
      tpu.vector_store %arg12[%c8, %c0_21], %31 {strides = array<i32>} : memref<24x128xf32, #tpu.memory_space<vmem>>, vector<8x128xf32>,
      %c0_22 = arith.constant 0 : index
      %c125 = arith.constant 125 : index
      %34 = vector.load %arg11[%c0_22, %c125] : memref<8x384xf32, #tpu.memory_space<vmem>>, vector<8x128xf32>
      %c0_23 = arith.constant 0 : index
      %c0_24 = arith.constant 0 : index
      %35 = vector.load %arg12[%c0_23, %c0_24] : memref<24x128xf32, #tpu.memory_space<vmem>>, vector<8x128xf32>
      tpu.vector_store %arg12[%c0_23, %c0_24], %34 {strides = array<i32>} : memref<24x128xf32, #tpu.memory_space<vmem>>, vector<8x128xf32>,
      %c0_25 = arith.constant 0 : index
      %c131 = arith.constant 131 : index
      %36 = vector.load %arg11[%c0_25, %c131] : memref<8x384xf32, #tpu.memory_space<vmem>>, vector<8x128xf32>
      %c16 = arith.constant 16 : index
      %c0_26 = arith.constant 0 : index
      %37 = vector.load %arg12[%c16, %c0_26] : memref<24x128xf32, #tpu.memory_space<vmem>>, vector<8x128xf32>
      tpu.vector_store %arg12[%c16, %c0_26], %36 {strides = array<i32>} : memref<24x128xf32, #tpu.memory_space<vmem>>, vector<8x128xf32>,
      %c0_27 = arith.constant 0 : index
      %c0_28 = arith.constant 0 : index
      %c0_29 = arith.constant 0 : index
      %38 = vector.load %arg3[%c0_27, %c0_28, %c0_29] : memref<1x8x24xbf16, #tpu.memory_space<vmem>>, vector<1x8x24xbf16>
      %39 = vector.shape_cast %38 : vector<1x8x24xbf16> to vector<8x24xbf16>
      %c0_30 = arith.constant 0 : index
      %c0_31 = arith.constant 0 : index
      %40 = vector.load %arg12[%c0_30, %c0_31] : memref<24x128xf32, #tpu.memory_space<vmem>>, vector<24x128xf32>
      %41 = arith.truncf %40 : vector<24x128xf32> to vector<24x128xbf16>
      %cst_32 = arith.constant dense<0.000000e+00> : vector<8x128xf32>
      %42 = tpu.matmul %39, %41, %cst_32 {dimension_numbers = #tpu.dot_dimension_numbers<[1], [0], [0], [1], [0, 0, 1, 1], [], []>} : vector<8x24xbf16>, vector<24x128xbf16>, vector<8x128xf32> -> vector<8x128xf32>
      %c0_33 = arith.constant 0 : index
      %c0_34 = arith.constant 0 : index
      %c0_35 = arith.constant 0 : index
      %43 = vector.load %arg4[%c0_33, %c0_34, %c0_35] : memref<1x8x1xf32, #tpu.memory_space<vmem>>, vector<1x8x1xf32>
      %44 = vector.shape_cast %43 : vector<1x8x1xf32> to vector<8x1xf32>
      %45 = vector.broadcast %44 : vector<8x1xf32> to vector<8x128xf32>
      %46 = arith.addf %42, %45 : vector<8x128xf32>
      %cst_36 = arith.constant 0.000000e+00 : f32
      %47 = vector.shape_cast %5 : vector<1x128xi1> to vector<1x128xi1>
      %48 = vector.broadcast %47 : vector<1x128xi1> to vector<8x128xi1>
      %49 = vector.broadcast %cst_36 : f32 to vector<8x128xf32>
      %50 = arith.select %48, %46, %49 : vector<8x128xi1>, vector<8x128xf32>
      %c0_37 = arith.constant 0 : index
      %c128_38 = arith.constant 128 : index
      %51 = vector.load %arg11[%c0_37, %c128_38] : memref<8x384xf32, #tpu.memory_space<vmem>>, vector<8x128xf32>
      tpu.vector_store %arg11[%c0_37, %c128_38], %50 {strides = array<i32>} : memref<8x384xf32, #tpu.memory_space<vmem>>, vector<8x128xf32>,
      %c8_39 = arith.constant 8 : index
      %c0_40 = arith.constant 0 : index
      %52 = vector.load %arg12[%c8_39, %c0_40] : memref<24x128xf32, #tpu.memory_space<vmem>>, vector<8x128xf32>
      tpu.vector_store %arg12[%c8_39, %c0_40], %50 {strides = array<i32>} : memref<24x128xf32, #tpu.memory_space<vmem>>, vector<8x128xf32>,
      %c0_41 = arith.constant 0 : index
      %c123 = arith.constant 123 : index
      %53 = vector.load %arg11[%c0_41, %c123] : memref<8x384xf32, #tpu.memory_space<vmem>>, vector<8x128xf32>
      %c0_42 = arith.constant 0 : index
      %c0_43 = arith.constant 0 : index
      %54 = vector.load %arg12[%c0_42, %c0_43] : memref<24x128xf32, #tpu.memory_space<vmem>>, vector<8x128xf32>
      tpu.vector_store %arg12[%c0_42, %c0_43], %53 {strides = array<i32>} : memref<24x128xf32, #tpu.memory_space<vmem>>, vector<8x128xf32>,
      %c0_44 = arith.constant 0 : index
      %c133 = arith.constant 133 : index
      %55 = vector.load %arg11[%c0_44, %c133] : memref<8x384xf32, #tpu.memory_space<vmem>>, vector<8x128xf32>
      %c16_45 = arith.constant 16 : index
      %c0_46 = arith.constant 0 : index
      %56 = vector.load %arg12[%c16_45, %c0_46] : memref<24x128xf32, #tpu.memory_space<vmem>>, vector<8x128xf32>
      tpu.vector_store %arg12[%c16_45, %c0_46], %55 {strides = array<i32>} : memref<24x128xf32, #tpu.memory_space<vmem>>, vector<8x128xf32>,
      %c0_47 = arith.constant 0 : index
      %c0_48 = arith.constant 0 : index
      %c0_49 = arith.constant 0 : index
      %57 = vector.load %arg5[%c0_47, %c0_48, %c0_49] : memref<1x8x24xbf16, #tpu.memory_space<vmem>>, vector<1x8x24xbf16>
      %58 = vector.shape_cast %57 : vector<1x8x24xbf16> to vector<8x24xbf16>
      %c0_50 = arith.constant 0 : index
      %c0_51 = arith.constant 0 : index
      %59 = vector.load %arg12[%c0_50, %c0_51] : memref<24x128xf32, #tpu.memory_space<vmem>>, vector<24x128xf32>
      %60 = arith.truncf %59 : vector<24x128xf32> to vector<24x128xbf16>
      %cst_52 = arith.constant dense<0.000000e+00> : vector<8x128xf32>
      %61 = tpu.matmul %58, %60, %cst_52 {dimension_numbers = #tpu.dot_dimension_numbers<[1], [0], [0], [1], [0, 0, 1, 1], [], []>} : vector<8x24xbf16>, vector<24x128xbf16>, vector<8x128xf32> -> vector<8x128xf32>
      %c0_53 = arith.constant 0 : index
      %c0_54 = arith.constant 0 : index
      %c0_55 = arith.constant 0 : index
      %62 = vector.load %arg6[%c0_53, %c0_54, %c0_55] : memref<1x8x1xf32, #tpu.memory_space<vmem>>, vector<1x8x1xf32>
      %63 = vector.shape_cast %62 : vector<1x8x1xf32> to vector<8x1xf32>
      %64 = vector.broadcast %63 : vector<8x1xf32> to vector<8x128xf32>
      %65 = arith.addf %61, %64 : vector<8x128xf32>
      %c0_56 = arith.constant 0 : index
      %c0_57 = arith.constant 0 : index
      %c0_58 = arith.constant 0 : index
      %c0_59 = arith.constant 0 : index
      %66 = vector.load %arg9[%c0_56, %c0_57, %c0_58, %c0_59] : memref<1x1x8x128xf32, #tpu.memory_space<vmem>>, vector<1x1x8x128xf32>
      %67 = vector.shape_cast %66 : vector<1x1x8x128xf32> to vector<8x128xf32>
      %68 = vector.shape_cast %65 : vector<8x128xf32> to vector<1x1x8x128xf32>
      tpu.vector_store %arg9[%c0_56, %c0_57, %c0_58, %c0_59], %68 {strides = array<i32>} : memref<1x1x8x128xf32, #tpu.memory_space<vmem>>, vector<1x1x8x128xf32>,
      %cst_60 = arith.constant 0.000000e+00 : f32
      %69 = vector.shape_cast %5 : vector<1x128xi1> to vector<1x128xi1>
      %70 = vector.broadcast %69 : vector<1x128xi1> to vector<8x128xi1>
      %71 = vector.broadcast %cst_60 : f32 to vector<8x128xf32>
      %72 = arith.select %70, %65, %71 : vector<8x128xi1>, vector<8x128xf32>
      %c0_61 = arith.constant 0 : index
      %c128_62 = arith.constant 128 : index
      %73 = vector.load %arg11[%c0_61, %c128_62] : memref<8x384xf32, #tpu.memory_space<vmem>>, vector<8x128xf32>
      tpu.vector_store %arg11[%c0_61, %c128_62], %72 {strides = array<i32>} : memref<8x384xf32, #tpu.memory_space<vmem>>, vector<8x128xf32>,
      %c0_63 = arith.constant 0 : index
      %c123_64 = arith.constant 123 : index
      %74 = vector.load %arg11[%c0_63, %c123_64] : memref<8x384xf32, #tpu.memory_space<vmem>>, vector<8x128xf32>
      %c0_65 = arith.constant 0 : index
      %c0_66 = arith.constant 0 : index
      %75 = vector.load %arg13[%c0_65, %c0_66] : memref<192x128xf32, #tpu.memory_space<vmem>>, vector<8x128xf32>
      tpu.vector_store %arg13[%c0_65, %c0_66], %74 {strides = array<i32>} : memref<192x128xf32, #tpu.memory_space<vmem>>, vector<8x128xf32>,
      %c0_67 = arith.constant 0 : index
      %c124 = arith.constant 124 : index
      %76 = vector.load %arg11[%c0_67, %c124] : memref<8x384xf32, #tpu.memory_space<vmem>>, vector<8x128xf32>
      %c8_68 = arith.constant 8 : index
      %c0_69 = arith.constant 0 : index
      %77 = vector.load %arg13[%c8_68, %c0_69] : memref<192x128xf32, #tpu.memory_space<vmem>>, vector<8x128xf32>
      tpu.vector_store %arg13[%c8_68, %c0_69], %76 {strides = array<i32>} : memref<192x128xf32, #tpu.memory_space<vmem>>, vector<8x128xf32>,
      %c0_70 = arith.constant 0 : index
      %c125_71 = arith.constant 125 : index
      %78 = vector.load %arg11[%c0_70, %c125_71] : memref<8x384xf32, #tpu.memory_space<vmem>>, vector<8x128xf32>
      %c16_72 = arith.constant 16 : index
      %c0_73 = arith.constant 0 : index
      %79 = vector.load %arg13[%c16_72, %c0_73] : memref<192x128xf32, #tpu.memory_space<vmem>>, vector<8x128xf32>
      tpu.vector_store %arg13[%c16_72, %c0_73], %78 {strides = array<i32>} : memref<192x128xf32, #tpu.memory_space<vmem>>, vector<8x128xf32>,
      %c0_74 = arith.constant 0 : index
      %c126 = arith.constant 126 : index
      %80 = vector.load %arg11[%c0_74, %c126] : memref<8x384xf32, #tpu.memory_space<vmem>>, vector<8x128xf32>
      %c24 = arith.constant 24 : index
      %c0_75 = arith.constant 0 : index
      %81 = vector.load %arg13[%c24, %c0_75] : memref<192x128xf32, #tpu.memory_space<vmem>>, vector<8x128xf32>
      tpu.vector_store %arg13[%c24, %c0_75], %80 {strides = array<i32>} : memref<192x128xf32, #tpu.memory_space<vmem>>, vector<8x128xf32>,
      %c0_76 = arith.constant 0 : index
      %c127_77 = arith.constant 127 : index
      %82 = vector.load %arg11[%c0_76, %c127_77] : memref<8x384xf32, #tpu.memory_space<vmem>>, vector<8x128xf32>
      %c32 = arith.constant 32 : index
      %c0_78 = arith.constant 0 : index
      %83 = vector.load %arg13[%c32, %c0_78] : memref<192x128xf32, #tpu.memory_space<vmem>>, vector<8x128xf32>
      tpu.vector_store %arg13[%c32, %c0_78], %82 {strides = array<i32>} : memref<192x128xf32, #tpu.memory_space<vmem>>, vector<8x128xf32>,
      %c0_79 = arith.constant 0 : index
      %c128_80 = arith.constant 128 : index
      %84 = vector.load %arg11[%c0_79, %c128_80] : memref<8x384xf32, #tpu.memory_space<vmem>>, vector<8x128xf32>
      %c40 = arith.constant 40 : index
      %c0_81 = arith.constant 0 : index
      %85 = vector.load %arg13[%c40, %c0_81] : memref<192x128xf32, #tpu.memory_space<vmem>>, vector<8x128xf32>
      tpu.vector_store %arg13[%c40, %c0_81], %84 {strides = array<i32>} : memref<192x128xf32, #tpu.memory_space<vmem>>, vector<8x128xf32>,
      %c0_82 = arith.constant 0 : index
      %c129_83 = arith.constant 129 : index
      %86 = vector.load %arg11[%c0_82, %c129_83] : memref<8x384xf32, #tpu.memory_space<vmem>>, vector<8x128xf32>
      %c48 = arith.constant 48 : index
      %c0_84 = arith.constant 0 : index
      %87 = vector.load %arg13[%c48, %c0_84] : memref<192x128xf32, #tpu.memory_space<vmem>>, vector<8x128xf32>
      tpu.vector_store %arg13[%c48, %c0_84], %86 {strides = array<i32>} : memref<192x128xf32, #tpu.memory_space<vmem>>, vector<8x128xf32>,
      %c0_85 = arith.constant 0 : index
      %c130 = arith.constant 130 : index
      %88 = vector.load %arg11[%c0_85, %c130] : memref<8x384xf32, #tpu.memory_space<vmem>>, vector<8x128xf32>
      %c56 = arith.constant 56 : index
      %c0_86 = arith.constant 0 : index
      %89 = vector.load %arg13[%c56, %c0_86] : memref<192x128xf32, #tpu.memory_space<vmem>>, vector<8x128xf32>
      tpu.vector_store %arg13[%c56, %c0_86], %88 {strides = array<i32>} : memref<192x128xf32, #tpu.memory_space<vmem>>, vector<8x128xf32>,
      %c0_87 = arith.constant 0 : index
      %c131_88 = arith.constant 131 : index
      %90 = vector.load %arg11[%c0_87, %c131_88] : memref<8x384xf32, #tpu.memory_space<vmem>>, vector<8x128xf32>
      %c64 = arith.constant 64 : index
      %c0_89 = arith.constant 0 : index
      %91 = vector.load %arg13[%c64, %c0_89] : memref<192x128xf32, #tpu.memory_space<vmem>>, vector<8x128xf32>
      tpu.vector_store %arg13[%c64, %c0_89], %90 {strides = array<i32>} : memref<192x128xf32, #tpu.memory_space<vmem>>, vector<8x128xf32>,
      %c0_90 = arith.constant 0 : index
      %c132 = arith.constant 132 : index
      %92 = vector.load %arg11[%c0_90, %c132] : memref<8x384xf32, #tpu.memory_space<vmem>>, vector<8x128xf32>
      %c72 = arith.constant 72 : index
      %c0_91 = arith.constant 0 : index
      %93 = vector.load %arg13[%c72, %c0_91] : memref<192x128xf32, #tpu.memory_space<vmem>>, vector<8x128xf32>
      tpu.vector_store %arg13[%c72, %c0_91], %92 {strides = array<i32>} : memref<192x128xf32, #tpu.memory_space<vmem>>, vector<8x128xf32>,
      %c0_92 = arith.constant 0 : index
      %c133_93 = arith.constant 133 : index
      %94 = vector.load %arg11[%c0_92, %c133_93] : memref<8x384xf32, #tpu.memory_space<vmem>>, vector<8x128xf32>
      %c80 = arith.constant 80 : index
      %c0_94 = arith.constant 0 : index
      %95 = vector.load %arg13[%c80, %c0_94] : memref<192x128xf32, #tpu.memory_space<vmem>>, vector<8x128xf32>
      tpu.vector_store %arg13[%c80, %c0_94], %94 {strides = array<i32>} : memref<192x128xf32, #tpu.memory_space<vmem>>, vector<8x128xf32>,
      %c0_95 = arith.constant 0 : index
      %c134 = arith.constant 134 : index
      %96 = vector.load %arg11[%c0_95, %c134] : memref<8x384xf32, #tpu.memory_space<vmem>>, vector<8x128xf32>
      %c88 = arith.constant 88 : index
      %c0_96 = arith.constant 0 : index
      %97 = vector.load %arg13[%c88, %c0_96] : memref<192x128xf32, #tpu.memory_space<vmem>>, vector<8x128xf32>
      tpu.vector_store %arg13[%c88, %c0_96], %96 {strides = array<i32>} : memref<192x128xf32, #tpu.memory_space<vmem>>, vector<8x128xf32>,
      %c0_97 = arith.constant 0 : index
      %c0_98 = arith.constant 0 : index
      %c0_99 = arith.constant 0 : index
      %98 = vector.load %arg7[%c0_97, %c0_98, %c0_99] : memref<1x8x192xbf16, #tpu.memory_space<vmem>>, vector<1x8x96xbf16>
      %99 = vector.shape_cast %98 : vector<1x8x96xbf16> to vector<8x96xbf16>
      %c0_100 = arith.constant 0 : index
      %c0_101 = arith.constant 0 : index
      %100 = vector.load %arg13[%c0_100, %c0_101] : memref<192x128xf32, #tpu.memory_space<vmem>>, vector<96x128xf32>
      %101 = arith.truncf %100 : vector<96x128xf32> to vector<96x128xbf16>
      %cst_102 = arith.constant dense<0.000000e+00> : vector<8x128xf32>
      %102 = tpu.matmul %99, %101, %cst_102 {dimension_numbers = #tpu.dot_dimension_numbers<[1], [0], [0], [1], [0, 0, 1, 1], [], []>} : vector<8x96xbf16>, vector<96x128xbf16>, vector<8x128xf32> -> vector<8x128xf32>
      %c0_103 = arith.constant 0 : index
      %c0_104 = arith.constant 0 : index
      %c0_105 = arith.constant 0 : index
      %103 = vector.load %arg8[%c0_103, %c0_104, %c0_105] : memref<1x8x1xf32, #tpu.memory_space<vmem>>, vector<1x8x1xf32>
      %104 = vector.shape_cast %103 : vector<1x8x1xf32> to vector<8x1xf32>
      %105 = vector.broadcast %104 : vector<8x1xf32> to vector<8x128xf32>
      %106 = arith.addf %102, %105 : vector<8x128xf32>
      %cst_106 = arith.constant 0.000000e+00 : f32
      %107 = vector.broadcast %cst_106 : f32 to vector<8x128xf32>
      %108 = arith.maximumf %106, %107 : vector<8x128xf32>
      %c0_107 = arith.constant 0 : index
      %c0_108 = arith.constant 0 : index
      %c0_109 = arith.constant 0 : index
      %c0_110 = arith.constant 0 : index
      %109 = vector.load %arg10[%c0_107, %c0_108, %c0_109, %c0_110] : memref<1x1x8x128xf32, #tpu.memory_space<vmem>>, vector<1x1x8x128xf32>
      %110 = vector.shape_cast %109 : vector<1x1x8x128xf32> to vector<8x128xf32>
      %111 = vector.shape_cast %108 : vector<8x128xf32> to vector<1x1x8x128xf32>
      tpu.vector_store %arg10[%c0_107, %c0_108, %c0_109, %c0_110], %111 {strides = array<i32>} : memref<1x1x8x128xf32, #tpu.memory_space<vmem>>, vector<1x1x8x128xf32>,
    } else {
    }
    %c1_i32 = arith.constant 1 : i32
    %9 = arith.cmpi eq, %arg1, %c1_i32 : i32
    %10 = arith.extui %9 : i1 to i32
    %c0_i32_3 = arith.constant 0 : i32
    %11 = arith.cmpi ne, %10, %c0_i32_3 : i32
    scf.if %11 {
      %cst = arith.constant 0xFF800000 : f32
      %12 = vector.broadcast %cst : f32 to vector<8x128xf32>
      %c0_4 = arith.constant 0 : index
      %c0_5 = arith.constant 0 : index
      %13 = vector.load %arg11[%c0_4, %c0_5] : memref<8x384xf32, #tpu.memory_space<vmem>>, vector<8x128xf32>
      tpu.vector_store %arg11[%c0_4, %c0_5], %12 {strides = array<i32>} : memref<8x384xf32, #tpu.memory_space<vmem>>, vector<8x128xf32>,
      %c0_6 = arith.constant 0 : index
      %c256 = arith.constant 256 : index
      %14 = vector.load %arg11[%c0_6, %c256] : memref<8x384xf32, #tpu.memory_space<vmem>>, vector<8x128xf32>
      tpu.vector_store %arg11[%c0_6, %c256], %12 {strides = array<i32>} : memref<8x384xf32, #tpu.memory_space<vmem>>, vector<8x128xf32>,
      %cst_7 = arith.constant 0xFF800000 : f32
      %15 = vector.shape_cast %5 : vector<1x128xi1> to vector<1x128xi1>
      %16 = vector.broadcast %15 : vector<1x128xi1> to vector<8x128xi1>
      %17 = vector.broadcast %cst_7 : f32 to vector<8x128xf32>
      %18 = arith.select %16, %2, %17 : vector<8x128xi1>, vector<8x128xf32>
      %c0_8 = arith.constant 0 : index
      %c128 = arith.constant 128 : index
      %19 = vector.load %arg11[%c0_8, %c128] : memref<8x384xf32, #tpu.memory_space<vmem>>, vector<8x128xf32>
      tpu.vector_store %arg11[%c0_8, %c128], %18 {strides = array<i32>} : memref<8x384xf32, #tpu.memory_space<vmem>>, vector<8x128xf32>,
      %c0_9 = arith.constant 0 : index
      %c128_10 = arith.constant 128 : index
      %20 = vector.load %arg11[%c0_9, %c128_10] : memref<8x384xf32, #tpu.memory_space<vmem>>, vector<8x128xf32>
      %c0_11 = arith.constant 0 : index
      %c129 = arith.constant 129 : index
      %21 = vector.load %arg11[%c0_11, %c129] : memref<8x384xf32, #tpu.memory_space<vmem>>, vector<8x128xf32>
      %22 = arith.maximumf %20, %21 : vector<8x128xf32>
      %c0_12 = arith.constant 0 : index
      %c127 = arith.constant 127 : index
      %23 = vector.load %arg11[%c0_12, %c127] : memref<8x384xf32, #tpu.memory_space<vmem>>, vector<8x128xf32>
      %24 = arith.maximumf %22, %23 : vector<8x128xf32>
      %c0_13 = arith.constant 0 : index
      %c130 = arith.constant 130 : index
      %25 = vector.load %arg11[%c0_13, %c130] : memref<8x384xf32, #tpu.memory_space<vmem>>, vector<8x128xf32>
      %26 = arith.maximumf %24, %25 : vector<8x128xf32>
      %c0_14 = arith.constant 0 : index
      %c126 = arith.constant 126 : index
      %27 = vector.load %arg11[%c0_14, %c126] : memref<8x384xf32, #tpu.memory_space<vmem>>, vector<8x128xf32>
      %28 = arith.maximumf %26, %27 : vector<8x128xf32>
      %cst_15 = arith.constant 0.000000e+00 : f32
      %29 = vector.broadcast %cst_15 : f32 to vector<8x128xf32>
      %c0_16 = arith.constant 0 : index
      %c0_17 = arith.constant 0 : index
      %30 = vector.load %arg11[%c0_16, %c0_17] : memref<8x384xf32, #tpu.memory_space<vmem>>, vector<8x128xf32>
      tpu.vector_store %arg11[%c0_16, %c0_17], %29 {strides = array<i32>} : memref<8x384xf32, #tpu.memory_space<vmem>>, vector<8x128xf32>,
      %c0_18 = arith.constant 0 : index
      %c256_19 = arith.constant 256 : index
      %31 = vector.load %arg11[%c0_18, %c256_19] : memref<8x384xf32, #tpu.memory_space<vmem>>, vector<8x128xf32>
      tpu.vector_store %arg11[%c0_18, %c256_19], %29 {strides = array<i32>} : memref<8x384xf32, #tpu.memory_space<vmem>>, vector<8x128xf32>,
      %cst_20 = arith.constant 0.000000e+00 : f32
      %32 = vector.shape_cast %5 : vector<1x128xi1> to vector<1x128xi1>
      %33 = vector.broadcast %32 : vector<1x128xi1> to vector<8x128xi1>
      %34 = vector.broadcast %cst_20 : f32 to vector<8x128xf32>
      %35 = arith.select %33, %28, %34 : vector<8x128xi1>, vector<8x128xf32>
      %c0_21 = arith.constant 0 : index
      %c128_22 = arith.constant 128 : index
      %36 = vector.load %arg11[%c0_21, %c128_22] : memref<8x384xf32, #tpu.memory_space<vmem>>, vector<8x128xf32>
      tpu.vector_store %arg11[%c0_21, %c128_22], %35 {strides = array<i32>} : memref<8x384xf32, #tpu.memory_space<vmem>>, vector<8x128xf32>,
      %c8 = arith.constant 8 : index
      %c0_23 = arith.constant 0 : index
      %37 = vector.load %arg12[%c8, %c0_23] : memref<24x128xf32, #tpu.memory_space<vmem>>, vector<8x128xf32>
      tpu.vector_store %arg12[%c8, %c0_23], %35 {strides = array<i32>} : memref<24x128xf32, #tpu.memory_space<vmem>>, vector<8x128xf32>,
      %c0_24 = arith.constant 0 : index
      %c123 = arith.constant 123 : index
      %38 = vector.load %arg11[%c0_24, %c123] : memref<8x384xf32, #tpu.memory_space<vmem>>, vector<8x128xf32>
      %c0_25 = arith.constant 0 : index
      %c0_26 = arith.constant 0 : index
      %39 = vector.load %arg12[%c0_25, %c0_26] : memref<24x128xf32, #tpu.memory_space<vmem>>, vector<8x128xf32>
      tpu.vector_store %arg12[%c0_25, %c0_26], %38 {strides = array<i32>} : memref<24x128xf32, #tpu.memory_space<vmem>>, vector<8x128xf32>,
      %c0_27 = arith.constant 0 : index
      %c133 = arith.constant 133 : index
      %40 = vector.load %arg11[%c0_27, %c133] : memref<8x384xf32, #tpu.memory_space<vmem>>, vector<8x128xf32>
      %c16 = arith.constant 16 : index
      %c0_28 = arith.constant 0 : index
      %41 = vector.load %arg12[%c16, %c0_28] : memref<24x128xf32, #tpu.memory_space<vmem>>, vector<8x128xf32>
      tpu.vector_store %arg12[%c16, %c0_28], %40 {strides = array<i32>} : memref<24x128xf32, #tpu.memory_space<vmem>>, vector<8x128xf32>,
      %c0_29 = arith.constant 0 : index
      %c0_30 = arith.constant 0 : index
      %c0_31 = arith.constant 0 : index
      %42 = vector.load %arg3[%c0_29, %c0_30, %c0_31] : memref<1x8x24xbf16, #tpu.memory_space<vmem>>, vector<1x8x24xbf16>
      %43 = vector.shape_cast %42 : vector<1x8x24xbf16> to vector<8x24xbf16>
      %c0_32 = arith.constant 0 : index
      %c0_33 = arith.constant 0 : index
      %44 = vector.load %arg12[%c0_32, %c0_33] : memref<24x128xf32, #tpu.memory_space<vmem>>, vector<24x128xf32>
      %45 = arith.truncf %44 : vector<24x128xf32> to vector<24x128xbf16>
      %cst_34 = arith.constant dense<0.000000e+00> : vector<8x128xf32>
      %46 = tpu.matmul %43, %45, %cst_34 {dimension_numbers = #tpu.dot_dimension_numbers<[1], [0], [0], [1], [0, 0, 1, 1], [], []>} : vector<8x24xbf16>, vector<24x128xbf16>, vector<8x128xf32> -> vector<8x128xf32>
      %c0_35 = arith.constant 0 : index
      %c0_36 = arith.constant 0 : index
      %c0_37 = arith.constant 0 : index
      %47 = vector.load %arg4[%c0_35, %c0_36, %c0_37] : memref<1x8x1xf32, #tpu.memory_space<vmem>>, vector<1x8x1xf32>
      %48 = vector.shape_cast %47 : vector<1x8x1xf32> to vector<8x1xf32>
      %49 = vector.broadcast %48 : vector<8x1xf32> to vector<8x128xf32>
      %50 = arith.addf %46, %49 : vector<8x128xf32>
      %cst_38 = arith.constant 0.000000e+00 : f32
      %51 = vector.shape_cast %5 : vector<1x128xi1> to vector<1x128xi1>
      %52 = vector.broadcast %51 : vector<1x128xi1> to vector<8x128xi1>
      %53 = vector.broadcast %cst_38 : f32 to vector<8x128xf32>
      %54 = arith.select %52, %50, %53 : vector<8x128xi1>, vector<8x128xf32>
      %c0_39 = arith.constant 0 : index
      %c128_40 = arith.constant 128 : index
      %55 = vector.load %arg11[%c0_39, %c128_40] : memref<8x384xf32, #tpu.memory_space<vmem>>, vector<8x128xf32>
      tpu.vector_store %arg11[%c0_39, %c128_40], %54 {strides = array<i32>} : memref<8x384xf32, #tpu.memory_space<vmem>>, vector<8x128xf32>,
      %c8_41 = arith.constant 8 : index
      %c0_42 = arith.constant 0 : index
      %56 = vector.load %arg12[%c8_41, %c0_42] : memref<24x128xf32, #tpu.memory_space<vmem>>, vector<8x128xf32>
      tpu.vector_store %arg12[%c8_41, %c0_42], %54 {strides = array<i32>} : memref<24x128xf32, #tpu.memory_space<vmem>>, vector<8x128xf32>,
      %c0_43 = arith.constant 0 : index
      %c119 = arith.constant 119 : index
      %57 = vector.load %arg11[%c0_43, %c119] : memref<8x384xf32, #tpu.memory_space<vmem>>, vector<8x128xf32>
      %c0_44 = arith.constant 0 : index
      %c0_45 = arith.constant 0 : index
      %58 = vector.load %arg12[%c0_44, %c0_45] : memref<24x128xf32, #tpu.memory_space<vmem>>, vector<8x128xf32>
      tpu.vector_store %arg12[%c0_44, %c0_45], %57 {strides = array<i32>} : memref<24x128xf32, #tpu.memory_space<vmem>>, vector<8x128xf32>,
      %c0_46 = arith.constant 0 : index
      %c137 = arith.constant 137 : index
      %59 = vector.load %arg11[%c0_46, %c137] : memref<8x384xf32, #tpu.memory_space<vmem>>, vector<8x128xf32>
      %c16_47 = arith.constant 16 : index
      %c0_48 = arith.constant 0 : index
      %60 = vector.load %arg12[%c16_47, %c0_48] : memref<24x128xf32, #tpu.memory_space<vmem>>, vector<8x128xf32>
      tpu.vector_store %arg12[%c16_47, %c0_48], %59 {strides = array<i32>} : memref<24x128xf32, #tpu.memory_space<vmem>>, vector<8x128xf32>,
      %c0_49 = arith.constant 0 : index
      %c0_50 = arith.constant 0 : index
      %c0_51 = arith.constant 0 : index
      %61 = vector.load %arg5[%c0_49, %c0_50, %c0_51] : memref<1x8x24xbf16, #tpu.memory_space<vmem>>, vector<1x8x24xbf16>
      %62 = vector.shape_cast %61 : vector<1x8x24xbf16> to vector<8x24xbf16>
      %c0_52 = arith.constant 0 : index
      %c0_53 = arith.constant 0 : index
      %63 = vector.load %arg12[%c0_52, %c0_53] : memref<24x128xf32, #tpu.memory_space<vmem>>, vector<24x128xf32>
      %64 = arith.truncf %63 : vector<24x128xf32> to vector<24x128xbf16>
      %cst_54 = arith.constant dense<0.000000e+00> : vector<8x128xf32>
      %65 = tpu.matmul %62, %64, %cst_54 {dimension_numbers = #tpu.dot_dimension_numbers<[1], [0], [0], [1], [0, 0, 1, 1], [], []>} : vector<8x24xbf16>, vector<24x128xbf16>, vector<8x128xf32> -> vector<8x128xf32>
      %c0_55 = arith.constant 0 : index
      %c0_56 = arith.constant 0 : index
      %c0_57 = arith.constant 0 : index
      %66 = vector.load %arg6[%c0_55, %c0_56, %c0_57] : memref<1x8x1xf32, #tpu.memory_space<vmem>>, vector<1x8x1xf32>
      %67 = vector.shape_cast %66 : vector<1x8x1xf32> to vector<8x1xf32>
      %68 = vector.broadcast %67 : vector<8x1xf32> to vector<8x128xf32>
      %69 = arith.addf %65, %68 : vector<8x128xf32>
      %c0_58 = arith.constant 0 : index
      %c0_59 = arith.constant 0 : index
      %c0_60 = arith.constant 0 : index
      %c0_61 = arith.constant 0 : index
      %70 = vector.load %arg9[%c0_58, %c0_59, %c0_60, %c0_61] : memref<1x1x8x128xf32, #tpu.memory_space<vmem>>, vector<1x1x8x128xf32>
      %71 = vector.shape_cast %70 : vector<1x1x8x128xf32> to vector<8x128xf32>
      %72 = vector.shape_cast %69 : vector<8x128xf32> to vector<1x1x8x128xf32>
      tpu.vector_store %arg9[%c0_58, %c0_59, %c0_60, %c0_61], %72 {strides = array<i32>} : memref<1x1x8x128xf32, #tpu.memory_space<vmem>>, vector<1x1x8x128xf32>,
      %cst_62 = arith.constant 0.000000e+00 : f32
      %73 = vector.shape_cast %5 : vector<1x128xi1> to vector<1x128xi1>
      %74 = vector.broadcast %73 : vector<1x128xi1> to vector<8x128xi1>
      %75 = vector.broadcast %cst_62 : f32 to vector<8x128xf32>
      %76 = arith.select %74, %69, %75 : vector<8x128xi1>, vector<8x128xf32>
      %c0_63 = arith.constant 0 : index
      %c128_64 = arith.constant 128 : index
      %77 = vector.load %arg11[%c0_63, %c128_64] : memref<8x384xf32, #tpu.memory_space<vmem>>, vector<8x128xf32>
      tpu.vector_store %arg11[%c0_63, %c128_64], %76 {strides = array<i32>} : memref<8x384xf32, #tpu.memory_space<vmem>>, vector<8x128xf32>,
      %c0_65 = arith.constant 0 : index
      %c117 = arith.constant 117 : index
      %78 = vector.load %arg11[%c0_65, %c117] : memref<8x384xf32, #tpu.memory_space<vmem>>, vector<8x128xf32>
      %c0_66 = arith.constant 0 : index
      %c0_67 = arith.constant 0 : index
      %79 = vector.load %arg13[%c0_66, %c0_67] : memref<192x128xf32, #tpu.memory_space<vmem>>, vector<8x128xf32>
      tpu.vector_store %arg13[%c0_66, %c0_67], %78 {strides = array<i32>} : memref<192x128xf32, #tpu.memory_space<vmem>>, vector<8x128xf32>,
      %c0_68 = arith.constant 0 : index
      %c118 = arith.constant 118 : index
      %80 = vector.load %arg11[%c0_68, %c118] : memref<8x384xf32, #tpu.memory_space<vmem>>, vector<8x128xf32>
      %c8_69 = arith.constant 8 : index
      %c0_70 = arith.constant 0 : index
      %81 = vector.load %arg13[%c8_69, %c0_70] : memref<192x128xf32, #tpu.memory_space<vmem>>, vector<8x128xf32>
      tpu.vector_store %arg13[%c8_69, %c0_70], %80 {strides = array<i32>} : memref<192x128xf32, #tpu.memory_space<vmem>>, vector<8x128xf32>,
      %c0_71 = arith.constant 0 : index
      %c119_72 = arith.constant 119 : index
      %82 = vector.load %arg11[%c0_71, %c119_72] : memref<8x384xf32, #tpu.memory_space<vmem>>, vector<8x128xf32>
      %c16_73 = arith.constant 16 : index
      %c0_74 = arith.constant 0 : index
      %83 = vector.load %arg13[%c16_73, %c0_74] : memref<192x128xf32, #tpu.memory_space<vmem>>, vector<8x128xf32>
      tpu.vector_store %arg13[%c16_73, %c0_74], %82 {strides = array<i32>} : memref<192x128xf32, #tpu.memory_space<vmem>>, vector<8x128xf32>,
      %c0_75 = arith.constant 0 : index
      %c120 = arith.constant 120 : index
      %84 = vector.load %arg11[%c0_75, %c120] : memref<8x384xf32, #tpu.memory_space<vmem>>, vector<8x128xf32>
      %c24 = arith.constant 24 : index
      %c0_76 = arith.constant 0 : index
      %85 = vector.load %arg13[%c24, %c0_76] : memref<192x128xf32, #tpu.memory_space<vmem>>, vector<8x128xf32>
      tpu.vector_store %arg13[%c24, %c0_76], %84 {strides = array<i32>} : memref<192x128xf32, #tpu.memory_space<vmem>>, vector<8x128xf32>,
      %c0_77 = arith.constant 0 : index
      %c121 = arith.constant 121 : index
      %86 = vector.load %arg11[%c0_77, %c121] : memref<8x384xf32, #tpu.memory_space<vmem>>, vector<8x128xf32>
      %c32 = arith.constant 32 : index
      %c0_78 = arith.constant 0 : index
      %87 = vector.load %arg13[%c32, %c0_78] : memref<192x128xf32, #tpu.memory_space<vmem>>, vector<8x128xf32>
      tpu.vector_store %arg13[%c32, %c0_78], %86 {strides = array<i32>} : memref<192x128xf32, #tpu.memory_space<vmem>>, vector<8x128xf32>,
      %c0_79 = arith.constant 0 : index
      %c122 = arith.constant 122 : index
      %88 = vector.load %arg11[%c0_79, %c122] : memref<8x384xf32, #tpu.memory_space<vmem>>, vector<8x128xf32>
      %c40 = arith.constant 40 : index
      %c0_80 = arith.constant 0 : index
      %89 = vector.load %arg13[%c40, %c0_80] : memref<192x128xf32, #tpu.memory_space<vmem>>, vector<8x128xf32>
      tpu.vector_store %arg13[%c40, %c0_80], %88 {strides = array<i32>} : memref<192x128xf32, #tpu.memory_space<vmem>>, vector<8x128xf32>,
      %c0_81 = arith.constant 0 : index
      %c123_82 = arith.constant 123 : index
      %90 = vector.load %arg11[%c0_81, %c123_82] : memref<8x384xf32, #tpu.memory_space<vmem>>, vector<8x128xf32>
      %c48 = arith.constant 48 : index
      %c0_83 = arith.constant 0 : index
      %91 = vector.load %arg13[%c48, %c0_83] : memref<192x128xf32, #tpu.memory_space<vmem>>, vector<8x128xf32>
      tpu.vector_store %arg13[%c48, %c0_83], %90 {strides = array<i32>} : memref<192x128xf32, #tpu.memory_space<vmem>>, vector<8x128xf32>,
      %c0_84 = arith.constant 0 : index
      %c124 = arith.constant 124 : index
      %92 = vector.load %arg11[%c0_84, %c124] : memref<8x384xf32, #tpu.memory_space<vmem>>, vector<8x128xf32>
      %c56 = arith.constant 56 : index
      %c0_85 = arith.constant 0 : index
      %93 = vector.load %arg13[%c56, %c0_85] : memref<192x128xf32, #tpu.memory_space<vmem>>, vector<8x128xf32>
      tpu.vector_store %arg13[%c56, %c0_85], %92 {strides = array<i32>} : memref<192x128xf32, #tpu.memory_space<vmem>>, vector<8x128xf32>,
      %c0_86 = arith.constant 0 : index
      %c125 = arith.constant 125 : index
      %94 = vector.load %arg11[%c0_86, %c125] : memref<8x384xf32, #tpu.memory_space<vmem>>, vector<8x128xf32>
      %c64 = arith.constant 64 : index
      %c0_87 = arith.constant 0 : index
      %95 = vector.load %arg13[%c64, %c0_87] : memref<192x128xf32, #tpu.memory_space<vmem>>, vector<8x128xf32>
      tpu.vector_store %arg13[%c64, %c0_87], %94 {strides = array<i32>} : memref<192x128xf32, #tpu.memory_space<vmem>>, vector<8x128xf32>,
      %c0_88 = arith.constant 0 : index
      %c126_89 = arith.constant 126 : index
      %96 = vector.load %arg11[%c0_88, %c126_89] : memref<8x384xf32, #tpu.memory_space<vmem>>, vector<8x128xf32>
      %c72 = arith.constant 72 : index
      %c0_90 = arith.constant 0 : index
      %97 = vector.load %arg13[%c72, %c0_90] : memref<192x128xf32, #tpu.memory_space<vmem>>, vector<8x128xf32>
      tpu.vector_store %arg13[%c72, %c0_90], %96 {strides = array<i32>} : memref<192x128xf32, #tpu.memory_space<vmem>>, vector<8x128xf32>,
      %c0_91 = arith.constant 0 : index
      %c127_92 = arith.constant 127 : index
      %98 = vector.load %arg11[%c0_91, %c127_92] : memref<8x384xf32, #tpu.memory_space<vmem>>, vector<8x128xf32>
      %c80 = arith.constant 80 : index
      %c0_93 = arith.constant 0 : index
      %99 = vector.load %arg13[%c80, %c0_93] : memref<192x128xf32, #tpu.memory_space<vmem>>, vector<8x128xf32>
      tpu.vector_store %arg13[%c80, %c0_93], %98 {strides = array<i32>} : memref<192x128xf32, #tpu.memory_space<vmem>>, vector<8x128xf32>,
      %c0_94 = arith.constant 0 : index
      %c128_95 = arith.constant 128 : index
      %100 = vector.load %arg11[%c0_94, %c128_95] : memref<8x384xf32, #tpu.memory_space<vmem>>, vector<8x128xf32>
      %c88 = arith.constant 88 : index
      %c0_96 = arith.constant 0 : index
      %101 = vector.load %arg13[%c88, %c0_96] : memref<192x128xf32, #tpu.memory_space<vmem>>, vector<8x128xf32>
      tpu.vector_store %arg13[%c88, %c0_96], %100 {strides = array<i32>} : memref<192x128xf32, #tpu.memory_space<vmem>>, vector<8x128xf32>,
      %c0_97 = arith.constant 0 : index
      %c129_98 = arith.constant 129 : index
      %102 = vector.load %arg11[%c0_97, %c129_98] : memref<8x384xf32, #tpu.memory_space<vmem>>, vector<8x128xf32>
      %c96 = arith.constant 96 : index
      %c0_99 = arith.constant 0 : index
      %103 = vector.load %arg13[%c96, %c0_99] : memref<192x128xf32, #tpu.memory_space<vmem>>, vector<8x128xf32>
      tpu.vector_store %arg13[%c96, %c0_99], %102 {strides = array<i32>} : memref<192x128xf32, #tpu.memory_space<vmem>>, vector<8x128xf32>,
      %c0_100 = arith.constant 0 : index
      %c130_101 = arith.constant 130 : index
      %104 = vector.load %arg11[%c0_100, %c130_101] : memref<8x384xf32, #tpu.memory_space<vmem>>, vector<8x128xf32>
      %c104 = arith.constant 104 : index
      %c0_102 = arith.constant 0 : index
      %105 = vector.load %arg13[%c104, %c0_102] : memref<192x128xf32, #tpu.memory_space<vmem>>, vector<8x128xf32>
      tpu.vector_store %arg13[%c104, %c0_102], %104 {strides = array<i32>} : memref<192x128xf32, #tpu.memory_space<vmem>>, vector<8x128xf32>,
      %c0_103 = arith.constant 0 : index
      %c131 = arith.constant 131 : index
      %106 = vector.load %arg11[%c0_103, %c131] : memref<8x384xf32, #tpu.memory_space<vmem>>, vector<8x128xf32>
      %c112 = arith.constant 112 : index
      %c0_104 = arith.constant 0 : index
      %107 = vector.load %arg13[%c112, %c0_104] : memref<192x128xf32, #tpu.memory_space<vmem>>, vector<8x128xf32>
      tpu.vector_store %arg13[%c112, %c0_104], %106 {strides = array<i32>} : memref<192x128xf32, #tpu.memory_space<vmem>>, vector<8x128xf32>,
      %c0_105 = arith.constant 0 : index
      %c132 = arith.constant 132 : index
      %108 = vector.load %arg11[%c0_105, %c132] : memref<8x384xf32, #tpu.memory_space<vmem>>, vector<8x128xf32>
      %c120_106 = arith.constant 120 : index
      %c0_107 = arith.constant 0 : index
      %109 = vector.load %arg13[%c120_106, %c0_107] : memref<192x128xf32, #tpu.memory_space<vmem>>, vector<8x128xf32>
      tpu.vector_store %arg13[%c120_106, %c0_107], %108 {strides = array<i32>} : memref<192x128xf32, #tpu.memory_space<vmem>>, vector<8x128xf32>,
      %c0_108 = arith.constant 0 : index
      %c133_109 = arith.constant 133 : index
      %110 = vector.load %arg11[%c0_108, %c133_109] : memref<8x384xf32, #tpu.memory_space<vmem>>, vector<8x128xf32>
      %c128_110 = arith.constant 128 : index
      %c0_111 = arith.constant 0 : index
      %111 = vector.load %arg13[%c128_110, %c0_111] : memref<192x128xf32, #tpu.memory_space<vmem>>, vector<8x128xf32>
      tpu.vector_store %arg13[%c128_110, %c0_111], %110 {strides = array<i32>} : memref<192x128xf32, #tpu.memory_space<vmem>>, vector<8x128xf32>,
      %c0_112 = arith.constant 0 : index
      %c134 = arith.constant 134 : index
      %112 = vector.load %arg11[%c0_112, %c134] : memref<8x384xf32, #tpu.memory_space<vmem>>, vector<8x128xf32>
      %c136 = arith.constant 136 : index
      %c0_113 = arith.constant 0 : index
      %113 = vector.load %arg13[%c136, %c0_113] : memref<192x128xf32, #tpu.memory_space<vmem>>, vector<8x128xf32>
      tpu.vector_store %arg13[%c136, %c0_113], %112 {strides = array<i32>} : memref<192x128xf32, #tpu.memory_space<vmem>>, vector<8x128xf32>,
      %c0_114 = arith.constant 0 : index
      %c135 = arith.constant 135 : index
      %114 = vector.load %arg11[%c0_114, %c135] : memref<8x384xf32, #tpu.memory_space<vmem>>, vector<8x128xf32>
      %c144 = arith.constant 144 : index
      %c0_115 = arith.constant 0 : index
      %115 = vector.load %arg13[%c144, %c0_115] : memref<192x128xf32, #tpu.memory_space<vmem>>, vector<8x128xf32>
      tpu.vector_store %arg13[%c144, %c0_115], %114 {strides = array<i32>} : memref<192x128xf32, #tpu.memory_space<vmem>>, vector<8x128xf32>,
      %c0_116 = arith.constant 0 : index
      %c136_117 = arith.constant 136 : index
      %116 = vector.load %arg11[%c0_116, %c136_117] : memref<8x384xf32, #tpu.memory_space<vmem>>, vector<8x128xf32>
      %c152 = arith.constant 152 : index
      %c0_118 = arith.constant 0 : index
      %117 = vector.load %arg13[%c152, %c0_118] : memref<192x128xf32, #tpu.memory_space<vmem>>, vector<8x128xf32>
      tpu.vector_store %arg13[%c152, %c0_118], %116 {strides = array<i32>} : memref<192x128xf32, #tpu.memory_space<vmem>>, vector<8x128xf32>,
      %c0_119 = arith.constant 0 : index
      %c137_120 = arith.constant 137 : index
      %118 = vector.load %arg11[%c0_119, %c137_120] : memref<8x384xf32, #tpu.memory_space<vmem>>, vector<8x128xf32>
      %c160 = arith.constant 160 : index
      %c0_121 = arith.constant 0 : index
      %119 = vector.load %arg13[%c160, %c0_121] : memref<192x128xf32, #tpu.memory_space<vmem>>, vector<8x128xf32>
      tpu.vector_store %arg13[%c160, %c0_121], %118 {strides = array<i32>} : memref<192x128xf32, #tpu.memory_space<vmem>>, vector<8x128xf32>,
      %c0_122 = arith.constant 0 : index
      %c138 = arith.constant 138 : index
      %120 = vector.load %arg11[%c0_122, %c138] : memref<8x384xf32, #tpu.memory_space<vmem>>, vector<8x128xf32>
      %c168 = arith.constant 168 : index
      %c0_123 = arith.constant 0 : index
      %121 = vector.load %arg13[%c168, %c0_123] : memref<192x128xf32, #tpu.memory_space<vmem>>, vector<8x128xf32>
      tpu.vector_store %arg13[%c168, %c0_123], %120 {strides = array<i32>} : memref<192x128xf32, #tpu.memory_space<vmem>>, vector<8x128xf32>,
      %c0_124 = arith.constant 0 : index
      %c139 = arith.constant 139 : index
      %122 = vector.load %arg11[%c0_124, %c139] : memref<8x384xf32, #tpu.memory_space<vmem>>, vector<8x128xf32>
      %c176 = arith.constant 176 : index
      %c0_125 = arith.constant 0 : index
      %123 = vector.load %arg13[%c176, %c0_125] : memref<192x128xf32, #tpu.memory_space<vmem>>, vector<8x128xf32>
      tpu.vector_store %arg13[%c176, %c0_125], %122 {strides = array<i32>} : memref<192x128xf32, #tpu.memory_space<vmem>>, vector<8x128xf32>,
      %c0_126 = arith.constant 0 : index
      %c140 = arith.constant 140 : index
      %124 = vector.load %arg11[%c0_126, %c140] : memref<8x384xf32, #tpu.memory_space<vmem>>, vector<8x128xf32>
      %c184 = arith.constant 184 : index
      %c0_127 = arith.constant 0 : index
      %125 = vector.load %arg13[%c184, %c0_127] : memref<192x128xf32, #tpu.memory_space<vmem>>, vector<8x128xf32>
      tpu.vector_store %arg13[%c184, %c0_127], %124 {strides = array<i32>} : memref<192x128xf32, #tpu.memory_space<vmem>>, vector<8x128xf32>,
      %c0_128 = arith.constant 0 : index
      %c0_129 = arith.constant 0 : index
      %c0_130 = arith.constant 0 : index
      %126 = vector.load %arg7[%c0_128, %c0_129, %c0_130] : memref<1x8x192xbf16, #tpu.memory_space<vmem>>, vector<1x8x192xbf16>
      %127 = vector.shape_cast %126 : vector<1x8x192xbf16> to vector<8x192xbf16>
      %c0_131 = arith.constant 0 : index
      %c0_132 = arith.constant 0 : index
      %128 = vector.load %arg13[%c0_131, %c0_132] : memref<192x128xf32, #tpu.memory_space<vmem>>, vector<192x128xf32>
      %129 = arith.truncf %128 : vector<192x128xf32> to vector<192x128xbf16>
      %cst_133 = arith.constant dense<0.000000e+00> : vector<8x128xf32>
      %130 = tpu.matmul %127, %129, %cst_133 {dimension_numbers = #tpu.dot_dimension_numbers<[1], [0], [0], [1], [0, 0, 1, 1], [], []>} : vector<8x192xbf16>, vector<192x128xbf16>, vector<8x128xf32> -> vector<8x128xf32>
      %c0_134 = arith.constant 0 : index
      %c0_135 = arith.constant 0 : index
      %c0_136 = arith.constant 0 : index
      %131 = vector.load %arg8[%c0_134, %c0_135, %c0_136] : memref<1x8x1xf32, #tpu.memory_space<vmem>>, vector<1x8x1xf32>
      %132 = vector.shape_cast %131 : vector<1x8x1xf32> to vector<8x1xf32>
      %133 = vector.broadcast %132 : vector<8x1xf32> to vector<8x128xf32>
      %134 = arith.addf %130, %133 : vector<8x128xf32>
      %cst_137 = arith.constant 0.000000e+00 : f32
      %135 = vector.broadcast %cst_137 : f32 to vector<8x128xf32>
      %136 = arith.maximumf %134, %135 : vector<8x128xf32>
      %c0_138 = arith.constant 0 : index
      %c0_139 = arith.constant 0 : index
      %c0_140 = arith.constant 0 : index
      %c0_141 = arith.constant 0 : index
      %137 = vector.load %arg10[%c0_138, %c0_139, %c0_140, %c0_141] : memref<1x1x8x128xf32, #tpu.memory_space<vmem>>, vector<1x1x8x128xf32>
      %138 = vector.shape_cast %137 : vector<1x1x8x128xf32> to vector<8x128xf32>
      %139 = vector.shape_cast %136 : vector<8x128xf32> to vector<1x1x8x128xf32>
      tpu.vector_store %arg10[%c0_138, %c0_139, %c0_140, %c0_141], %139 {strides = array<i32>} : memref<1x1x8x128xf32, #tpu.memory_space<vmem>>, vector<1x1x8x128xf32>,
    } else {
    }
    return
  }
  func.func @transform_0(%arg0: i32, %arg1: i32) -> (i32, i32, i32) {
    %c0_i32 = arith.constant 0 : i32
    %c0_i32_0 = arith.constant 0 : i32
    %c0_i32_1 = arith.constant 0 : i32
    return %arg0, %c0_i32, %c0_i32_0 : i32, i32, i32
  }
  func.func @transform_1(%arg0: i32, %arg1: i32) -> (i32, i32, i32) {
    %c0_i32 = arith.constant 0 : i32
    %c0_i32_0 = arith.constant 0 : i32
    %c0_i32_1 = arith.constant 0 : i32
    return %arg1, %c0_i32, %c0_i32_0 : i32, i32, i32
  }
  func.func @transform_2(%arg0: i32, %arg1: i32) -> (i32, i32, i32) {
    %c0_i32 = arith.constant 0 : i32
    %c0_i32_0 = arith.constant 0 : i32
    %c0_i32_1 = arith.constant 0 : i32
    return %arg1, %c0_i32, %c0_i32_0 : i32, i32, i32
  }
  func.func @transform_3(%arg0: i32, %arg1: i32) -> (i32, i32, i32) {
    %c0_i32 = arith.constant 0 : i32
    %c0_i32_0 = arith.constant 0 : i32
    %c0_i32_1 = arith.constant 0 : i32
    return %arg1, %c0_i32, %c0_i32_0 : i32, i32, i32
  }
  func.func @transform_4(%arg0: i32, %arg1: i32) -> (i32, i32, i32) {
    %c0_i32 = arith.constant 0 : i32
    %c0_i32_0 = arith.constant 0 : i32
    %c0_i32_1 = arith.constant 0 : i32
    return %arg1, %c0_i32, %c0_i32_0 : i32, i32, i32
  }
  func.func @transform_5(%arg0: i32, %arg1: i32) -> (i32, i32, i32) {
    %c0_i32 = arith.constant 0 : i32
    %c0_i32_0 = arith.constant 0 : i32
    %c0_i32_1 = arith.constant 0 : i32
    return %arg1, %c0_i32, %c0_i32_0 : i32, i32, i32
  }
  func.func @transform_6(%arg0: i32, %arg1: i32) -> (i32, i32, i32) {
    %c0_i32 = arith.constant 0 : i32
    %c0_i32_0 = arith.constant 0 : i32
    %c0_i32_1 = arith.constant 0 : i32
    return %arg1, %c0_i32, %c0_i32_0 : i32, i32, i32
  }
  func.func @transform_7(%arg0: i32, %arg1: i32) -> (i32, i32, i32, i32) {
    %c0_i32 = arith.constant 0 : i32
    %c0_i32_0 = arith.constant 0 : i32
    %c0_i32_1 = arith.constant 0 : i32
    return %arg1, %arg0, %c0_i32, %c0_i32_0 : i32, i32, i32, i32
  }
  func.func @transform_8(%arg0: i32, %arg1: i32) -> (i32, i32, i32, i32) {
    %c0_i32 = arith.constant 0 : i32
    %c0_i32_0 = arith.constant 0 : i32
    %c0_i32_1 = arith.constant 0 : i32
    return %arg1, %arg0, %c0_i32, %c0_i32_0 : i32, i32, i32, i32
  }
}

</mosaic_0001>

<bundles_post_ra>
// kernel: neg.1
= control target key start
LH: loop header
LB: loop body
LE: loop exit
PB: predicated region body
PF: predicated region fallthrough
CT: control target
= control target key end

     0   :  { %s40_s0 = inlined_call_operand.vmem [shape: f32[2,2,32], index: 0, kind: input, shape index: {}]   ;;  %s41_s1 = inlined_call_operand.vmem [shape: f32[2,2,32], index: 1, kind: output, shape index: {}]  }
   0x1   :  { %v2_v0 = vld [vmem:[%s40_s0] sm:$0x3]  ;;  %v16_v1 = vld [vmem:[%s40_s0 + $0x2] sm:$0x3] }
   0x2   :  { %v5_v2 = vxor.u32 2147483648, %v2_v0  ;;  %v12_v3 = vxor.u32 2147483648, %v16_v1 }
   0x4   :  { %7 = vst [vmem:[%s41_s1] sm:$0x3] %v5_v2  ;;  %17 = vst [vmem:[%s41_s1 + $0x2] sm:$0x3] %v12_v3 }

// kernel: spn_forward.1
= control target key start
LH: loop header
LB: loop body
LE: loop exit
PB: predicated region body
PF: predicated region fallthrough
CT: control target
= control target key end

     0   :  { %s2038_s27 = smov 0   ;;  %s2040_s28 = smov 0   ;;  %s2397_s0 = inlined_call_operand.vmem [shape: bf16[2,8,128], index: 0, kind: input, shape index: {}]   ;;  %s2398_s1 = inlined_call_operand.vmem [shape: bf16[2,8,24], index: 1, kind: input, shape index: {}]   ;;  %s2399_s2 = inlined_call_operand.vmem [shape: f32[2,8,1], index: 2, kind: input, shape index: {}]   ;;  %s2400_s3 = inlined_call_operand.vmem [shape: bf16[2,8,24], index: 3, kind: input, shape index: {}]   ;;  %s2401_s4 = inlined_call_operand.vmem [shape: f32[2,8,1], index: 4, kind: input, shape index: {}]   ;;  %s2402_s5 = inlined_call_operand.vmem [shape: bf16[2,8,192], index: 5, kind: input, shape index: {}]   ;;  %s2403_s6 = inlined_call_operand.vmem [shape: f32[2,8,1], index: 6, kind: input, shape index: {}]   ;;  %s2404_s7 = inlined_call_operand.vmem [shape: f32[2,2,8,128], index: 7, kind: output, shape index: {0}]   ;;  %s2405_s8 = inlined_call_operand.vmem [shape: f32[2,2,8,128], index: 8, kind: output, shape index: {1}]  }
   0x1   :  { %2406 = sst [smem:[#allocation6_spill]] %s2397_s0  ;;  %s2042_s29 = smov 0  }
   0x2   :  { %2407 = sst [smem:[#allocation7_spill]] %s2398_s1  ;;  %s2044_s30 = smov 0  }
   0x3   :  { %2408 = sst [smem:[#allocation8_spill]] %s2399_s2  ;;  %s2046_s9 = smov 0  }
   0x4   :  { %2409 = sst [smem:[#allocation9_spill]] %s2400_s3 }
   0x5   :  { %2410 = sst [smem:[#allocation10_spill]] %s2401_s4 }
   0x6 LB: > { %s28_s10 = sadd.s32 1, %s1939_s29  ;;  %s31_s11 = sadd.s32 1, %s1943_s30  ;;  %s1947_s9 = sphi %s2046_s9, %s19_s9   ;;  %s1943_s30 = sphi %s2044_s30, %s2425_s30   ;;  %s1939_s29 = sphi %s2042_s29, %s2424_s29   ;;  %s1935_s28 = sphi %s2040_s28, %s2423_s28   ;;  %s1931_s27 = sphi %s2038_s27, %s2422_s27  }
   0x7   : > { %p29_p0 = scmp.ge.s32.totalorder %s28_s10, 2  ;;  %p1660_p1 = scmp.ge.s32.totalorder %s1947_s9, 1 }
   0x8   : > { %p335_p2 = scmp.lt.s32.totalorder %s1947_s9, 5 }
   0x9   : > { %s2427_s10 = smov (%p29_p0, %s28_s10), 0  ;;  %s2429_s11 = smov (!%p29_p0, %s31_s11), %s1943_s30 }
   0xa   : > { %p336_p3 = pnand %p1660_p1, %p335_p2  ;;  %p33_p4 = scmp.ge.s32.totalorder %s2429_s11, 2 }
   0xb   : > { %p404_p5 = scmp.lt.s32.totalorder (!%p336_p3), %s1935_s28, 1  ;;  %p408_p6 = scmp.lt.s32.totalorder (!%p336_p3), %s1931_s27, 1  ;;  %v452_v0 = vlaneseq (!%p336_p3) }
   0xc   : > { %s2431_s11 = smov (%p33_p4, %s2429_s11), 0  ;;  %339 = sbr.rel (%p336_p3) target bundleno = 2426 (0x97a), region = 48 }
   0xd   : > { %2411 = sst [smem:[#allocation5_spill]] %s2431_s11  ;;  %v2071_v1 = vand.u32 (!%p336_p3), 127, %v452_v0  ;;  %s2412_s0 = sld [smem:[#allocation6_spill]] (!%p336_p3) }
   0xe   : > { %s2413_s1 = sld [smem:[#allocation7_spill]] (!%p336_p3)  ;;  %s2414_s2 = sld [smem:[#allocation8_spill]] (!%p336_p3) }
   0xf   : > { %vm454_vm0 = vcmp.lt.s32.totalorder (!%p336_p3), %v2071_v1, 32  ;;  %s2415_s3 = sld [smem:[#allocation9_spill]] (!%p336_p3)  ;;  %s2416_s4 = sld [smem:[#allocation10_spill]] (!%p336_p3) }
  0x10   : > { %p1673_p7 = scmp.ne.s32.totalorder (!%p336_p3), %s1931_s27, 0 }
  0x13   : > { %s2433_s28 = smov (!%p404_p5, %s1935_s28), 1  ;;  %v1949_v5 = vmov (!%p1673_p7), -inf   ;;  %v1950_v7 = vmov (!%p1673_p7), 0.0   ;;  %vm474_vm1 = vcmask (!%p1673_p7), 1039360   ;;  %vm485_vm2 = vcmask (!%p1673_p7), 7168   ;;  %s1959_s18 = smov (!%p1673_p7), 123  }
  0x14   : > { %s409_s12 = scalar_select %p408_p6, %s1931_s27, 1 }
  0x15   : > { %s1661_s13 = sshll.u32 %s2433_s28, 2  ;;  %1705 = vmatprep.subr.bf16.mxu1 (!%p1673_p7), %v1950_v7  ;;  %1721 = vmatprep.subr.bf16.mxu0 (!%p1673_p7), %v1950_v7  ;;  %vm1953_vm3 = vmmov (!%p1673_p7), 0   ;;  %v1955_v22 = vmov (!%p1673_p7), 0   ;;  %vm502_vm4 = vcmask (!%p1673_p7), 23552   ;;  %vm514_vm5 = vcmask (!%p1673_p7), 1022976   ;;  %s1961_s22 = smov (!%p1673_p7), 126  }
  0x16   : > { %s407_s16 = scalar_lea.vmem %s2412_s0, %s1661_s13  ;;  %s1662_s17 = sshll.u32 %s409_s12, 2  ;;  %1709 = vmatprep.mubr.msk.bf16.mxu1 (!%p1673_p7), %vm1953_vm3, %v1950_v7  ;;  %1733 = vmatprep.mubr.msk.bf16.mxu0 (!%p1673_p7), %vm1953_vm3, %v1950_v7  ;;  %vm1957_vm6 = vmmov (!%p1673_p7), 1   ;;  %vm534_vm8 = vcmask (!%p1673_p7), 1043456   ;;  %vm530_vm9 = vcmask (!%p1673_p7), 195584   ;;  %vm589_vm10 = vcmask (!%p1673_p7), 39936  }
  0x17   : > { %s2081_s20 = scalar_lea.vmem %s2413_s1, %s1662_s17  ;;  %s1663_s21 = sshll.u32 %s409_s12, 3  ;;  %v2083_v2 = vld [vmem:[%s407_s16] sm:$0xf]  ;;  %1855 = vset.pattern.permute.xlu0 (!%p1673_p7), %v1955_v22  ;;  %1856 = vset.pattern.permute.xlu1 (!%p1673_p7), %v1955_v22  ;;  %vm2146_vm7 = vmpackc.low (!%p1673_p7), %vm454_vm0, %vm1957_vm6  ;;  %vm601_vm11 = vcmask (!%p1673_p7), 1006592   ;;  %vm744_vm12 = vcmask (!%p1673_p7), 1031168   ;;  %vm685_vm13 = vcmask (!%p1673_p7), 31744  }
  0x18   : > { %s2088_s24 = scalar_lea.vmem %s2414_s2, %s1663_s21  ;;  %s2093_s11 = scalar_lea.vmem %s2415_s3, %s1662_s17  ;;  %v451_v3 = vunpack.c.l.bf16 %v2083_v2  ;;  %v518_v36 = vld [vmem:[%s2081_s20] sm:$0xf] (!%p1673_p7)  ;;  %vm708_vm14 = vcmask (!%p1673_p7), 15360   ;;  %vm767_vm15 = vcmask (!%p1673_p7), 1014784  }
  0x19   : > { %s2099_s15 = scalar_lea.vmem %s2416_s4, %s1663_s21  ;;  %s2104_s19 = scalar_lea.vmem %s2402_s5, %s1663_s21  ;;  %v524_v21 = vld [vmem:[%s2088_s24] sm:$0xff] (!%p1673_p7) }
  0x1a   : > { %s2109_s0 = scalar_lea.vmem %s2403_s6, %s1663_s21  ;;  %s1669_s25 = sshll.u32 %s409_s12, 1  ;;  %v463_v4 = vsel (!%p1673_p7), %vm454_vm0, %v451_v3, -inf  ;;  %v611_v44 = vld [vmem:[%s2099_s15] sm:$0xff] (!%p1673_p7) }
  0x1b   : > { %s438_s17 = sadd.s32 %s1669_s25, %s2433_s28  ;;  %458 = sbr.rel (%p1673_p7) target bundleno = 1206 (0x4b6), region = 52  ;;  %v1835_v6 = vpack.i.bf16 (!%p1673_p7), %v1949_v5, %v463_v4  ;;  %v1840_v8 = vpack.i.bf16 (!%p1673_p7), %v463_v4, %v1949_v5  ;;  %v605_v54 = vld [vmem:[%s2093_s11] sm:$0xf] (!%p1673_p7) }
  0x1c   : > { %s1670_s26 = sshll.u32 %s438_s17, 3  ;;  %s1951_s1 = smov (!%p1673_p7), 127   ;;  %v813_v62 = vld [vmem:[%s2109_s0] sm:$0xff] (!%p1673_p7) }
  0x1d   : > { %s2114_s3 = scalar_lea.vmem %s2404_s7, %s1670_s26  ;;  %s2119_s4 = scalar_lea.vmem %s2405_s8, %s1670_s26  ;;  %1836 = vrot.lane.b32.xlu0 (!%p1673_p7), %v1835_v6, %s1951_s1 }
  0x1e   : > { %s1952_s2 = smov (!%p1673_p7), 1   ;;  %s1954_s28 = smov (!%p1673_p7), 3  }
  0x1f   : > { %s1956_s12 = smov (!%p1673_p7), 125   ;;  %s1958_s21 = smov (!%p1673_p7), 5  }
  0x20   : > { %s1960_s16 = smov (!%p1673_p7), 4   ;;  %s1962_s23 = smov (!%p1673_p7), 2  }
  0x21   : > { %1841 = vrot.lane.b32.xlu0 (!%p1673_p7), %v1840_v8, %s1952_s2  ;;  %s1963_s25 = smov (!%p1673_p7), 124   ;;  %s1964_s17 = smov (!%p1673_p7), 122  }
  0x25   : > { %527 = vperm.xlu0 %1855, %v524_v21  }
  0x8f   : > { %v1837_v9 = vpop.permute.xlu0 %1836 }
  0x90   : > { %v1839_v10 = vunpack.i.h.bf16 %v1837_v9  ;;  %v1838_v11 = vunpack.i.l.bf16 %v1837_v9 }
  0x92   : > { %v475_v12 = vsel %vm474_vm1, %v1838_v11, %v1839_v10 }
  0x93   : > { %v1842_v13 = vpop.permute.xlu0 %1841  ;;  %v477_v16 = vmax.f32 %v463_v4, %v475_v12 }
  0x94   : > { %v1844_v14 = vunpack.i.h.bf16 %v1842_v13  ;;  %v1843_v15 = vunpack.i.l.bf16 %v1842_v13 }
  0x96   : > { %v486_v17 = vsel %vm485_vm2, %v1843_v15, %v1844_v14 }
  0x97   : > { %v488_v18 = vmax.f32 %v477_v16, %v486_v17 }
  0x99   : > { %v491_v19 = vsel %vm454_vm0, %v488_v18, 0.0 }
  0x9a   : > { %v1845_v20 = vpack.i.bf16 %v491_v19, %v1950_v7  ;;  %v1850_v23 = vpack.i.bf16 %v1950_v7, %v491_v19 }
  0x9c   : > { %1846 = vrot.lane.b32.xlu1 %v1845_v20, %s1954_s28 }
  0xa0   : > { %1851 = vrot.lane.b32.xlu1 %v1850_v23, %s1956_s12 }
  0xa4   : > { %585 = vrot.lane.b32.xlu1 %v1950_v7, %s1958_s21  ;;  %v528_v37 = vpop.permute.xlu0 %527 }
 0x10e   : > { %v1847_v24 = vpop.permute.xlu1 %1846 }
 0x10f   : > { %v1849_v25 = vunpack.i.h.bf16 %v1847_v24  ;;  %v1848_v26 = vunpack.i.l.bf16 %v1847_v24 }
 0x111   : > { %v503_v27 = vsel %vm502_vm4, %v1848_v26, %v1849_v25 }
 0x112   : > { %v1852_v28 = vpop.permute.xlu1 %1851  ;;  %v1892_v32 = vpack.c.bf16 %v488_v18, %v503_v27 }
 0x113   : > { %v1854_v29 = vunpack.i.h.bf16 %v1852_v28  ;;  %v1853_v30 = vunpack.i.l.bf16 %v1852_v28 }
 0x114   : > { %1893 = vmatpush3.bf16.msk.msra.mxu1 %vm2146_vm7, %v1892_v32 }
 0x115   : > { %v515_v33 = vsel %vm514_vm5, %v1853_v30, %v1854_v29  ;;  %1707 = vmatprep.subr.bf16.mxu1 %v1950_v7 }
 0x116   : > { %v523_v34 = vpack.c.bf16 %v515_v33, %v515_v33  ;;  %v586_v45 = vpop.permute.xlu1 %585 }
 0x118   : > { %v536_v35 = vsel %vm534_vm8, %v523_v34, 0 }
 0x119   : > { %1708 = vmatpush3.bf16.msra.mxu1 %v536_v35 }
 0x11a   : > { %1713 = vmatprep.subr.bf16.mxu1 %v1950_v7 }
 0x11c   : > { %1710 = vmatmul.mubr.msk.bf16.vlgmr.msra.gmra.mrb[0].mxu1 %vm530_vm9, %v518_v36 }
 0x11d   : > { %1717 = vmatprep.mubr.msk.bf16.mxu1 %vm1953_vm3, %v1950_v7 }
 0x1ef   : > { %v572_v38 = vpop.f32.mrb[0].mxu1 }
 0x1f0   : > { %v573_v39 = vadd.f32 %v572_v38, %v528_v37  ;;  %v1711_v40 = vpop.f32.mrb[1].mxu1 }
 0x1f1   : > { %v575_v41 = vpop.f32.mrb[2].mxu1 }
 0x1f2   : > { %v578_v42 = vsel %vm454_vm0, %v573_v39, 0.0  ;;  %v1712_v43 = vpop.f32.mrb[3].mxu1 }
 0x1f3   : > { %597 = vrot.lane.b32.xlu0 %v578_v42, %s1959_s18  ;;  %587 = vrot.lane.b32.xlu1 %v578_v42, %s1958_s21  ;;  %v794_v42 = vld [vmem:[%s2104_s19] sm:$0xf] }
 0x1f7   : > { %614 = vperm.xlu0 %1855, %v611_v44   ;;  %599 = vrot.lane.b32.xlu1 %v1950_v7, %s1959_s18 }
 0x1fb   : > { %670 = vrot.lane.b32.xlu1 %v1950_v7, %s1958_s21  ;;  %731 = vrot.lane.b32.xlu0 %v1950_v7, %s1951_s1 }
 0x1ff   : > { %681 = vrot.lane.b32.xlu1 %v1950_v7, %s1960_s16  ;;  %742 = vrot.lane.b32.xlu0 %v1950_v7, %s1961_s22 }
 0x203   : > { %693 = vrot.lane.b32.xlu1 %v1950_v7, %s1954_s28  ;;  %754 = vrot.lane.b32.xlu0 %v1950_v7, %s1956_s12 }
 0x207   : > { %704 = vrot.lane.b32.xlu1 %v1950_v7, %s1962_s23 }
 0x20b   : > { %716 = vrot.lane.b32.xlu1 %v1950_v7, %s1952_s2 }
 0x265   : > { %v588_v46 = vpop.permute.xlu1 %587  ;;  %v598_v48 = vpop.permute.xlu0 %597 }
 0x266   : > { %v590_v47 = vsel %vm589_vm10, %v586_v45, %v588_v46 }
 0x267   : > { %v1895_v50 = vpack.c.bf16 %v573_v39, %v590_v47 }
 0x269   : > { %v600_v49 = vpop.permute.xlu1 %599  ;;  %1896 = vmatpush3.bf16.msk.msra.mxu1 %vm2146_vm7, %v1895_v50 }
 0x26a   : > { %v602_v51 = vsel %vm601_vm11, %v598_v48, %v600_v49  ;;  %1715 = vmatprep.subr.bf16.mxu1 %v1950_v7 }
 0x26b   : > { %v610_v52 = vpack.c.bf16 %v602_v51, %v602_v51 }
 0x26d   : > { %v621_v53 = vsel %vm534_vm8, %v610_v52, 0  ;;  %v671_v63 = vpop.permute.xlu1 %670 }
 0x26e   : > { %1716 = vmatpush3.bf16.msra.mxu1 %v621_v53 }
 0x271   : > { %1718 = vmatmul.mubr.msk.bf16.vlgmr.msra.gmra.mrb[4].mxu1 %vm530_vm9, %v605_v54  ;;  %v682_v0 = vpop.permute.xlu1 %681 }
 0x275   : > { %v694_v5 = vpop.permute.xlu1 %693 }
 0x276   : > { %v615_v55 = vpop.permute.xlu0 %614 }
 0x279   : > { %v705_v8 = vpop.permute.xlu1 %704 }
 0x27a   : > { %v732_v4 = vpop.permute.xlu0 %731 }
 0x27d   : > { %v717_v10 = vpop.permute.xlu1 %716 }
 0x27e   : > { %v743_v6 = vpop.permute.xlu0 %742 }
 0x282   : > { %v755_v9 = vpop.permute.xlu0 %754 }
 0x344   : > { %v657_v56 = vpop.f32.mrb[4].mxu1 }
 0x345   : > { %v658_v57 = vadd.f32 %v657_v56, %v615_v55  ;;  %v1719_v58 = vpop.f32.mrb[5].mxu1 }
 0x346   : > { %v660_v59 = vpop.f32.mrb[6].mxu1 }
 0x347   : > { %663 = vst [vmem:[%s2114_s3] sm:$0xff] %v658_v57  ;;  %v664_v60 = vsel %vm454_vm0, %v658_v57, 0.0  ;;  %v1720_v61 = vpop.f32.mrb[7].mxu1 }
 0x348   : > { %729 = vrot.lane.b32.xlu1 %v664_v60, %s1951_s1  ;;  %672 = vrot.lane.b32.xlu0 %v664_v60, %s1958_s21 }
 0x34c   : > { %740 = vrot.lane.b32.xlu1 %v664_v60, %s1961_s22  ;;  %683 = vrot.lane.b32.xlu0 %v664_v60, %s1960_s16 }
 0x350   : > { %752 = vrot.lane.b32.xlu1 %v664_v60, %s1956_s12  ;;  %695 = vrot.lane.b32.xlu0 %v664_v60, %s1954_s28 }
 0x354   : > { %763 = vrot.lane.b32.xlu1 %v664_v60, %s1963_s25  ;;  %706 = vrot.lane.b32.xlu0 %v664_v60, %s1962_s23 }
 0x358   : > { %775 = vrot.lane.b32.xlu1 %v664_v60, %s1959_s18  ;;  %718 = vrot.lane.b32.xlu0 %v664_v60, %s1952_s2 }
 0x35c   : > { %786 = vrot.lane.b32.xlu1 %v664_v60, %s1964_s17  ;;  %765 = vrot.lane.b32.xlu0 %v1950_v7, %s1963_s25 }
 0x360   : > { %777 = vrot.lane.b32.xlu0 %v1950_v7, %s1959_s18  ;;  %816 = vperm.xlu1 %1856, %v813_v62  }
 0x364   : > { %788 = vrot.lane.b32.xlu0 %v1950_v7, %s1964_s17 }
 0x3ba   : > { %v730_v11 = vpop.permute.xlu1 %729  ;;  %v673_v12 = vpop.permute.xlu0 %672 }
 0x3bb   : > { %v733_v13 = vsel %vm474_vm1, %v730_v11, %v732_v4  ;;  %v674_v14 = vsel %vm589_vm10, %v671_v63, %v673_v12  ;;  %vm790_vm1 = vcmask 998400  }
 0x3be   : > { %v741_v15 = vpop.permute.xlu1 %740  ;;  %v684_v16 = vpop.permute.xlu0 %683 }
 0x3bf   : > { %v745_v17 = vsel %vm744_vm12, %v741_v15, %v743_v6  ;;  %v686_v18 = vsel %vm685_vm13, %v682_v0, %v684_v16 }
 0x3c0   : > { %v807_v19 = vpack.c.bf16 %v686_v18, %v674_v14  ;;  %v810_v35 = vpack.c.bf16 %v745_v17, %v733_v13 }
 0x3c2   : > { %v753_v20 = vpop.permute.xlu1 %752  ;;  %v696_v21 = vpop.permute.xlu0 %695  ;;  %1722 = vmatpush3.bf16.msra.mxu0 %v807_v19 }
 0x3c3   : > { %v756_v22 = vsel %vm514_vm5, %v753_v20, %v755_v9  ;;  %v697_v23 = vsel %vm502_vm4, %v694_v5, %v696_v21  ;;  %1723 = vmatprep.subr.bf16.mxu0 %v1950_v7 }
 0x3c6   : > { %v707_v24 = vpop.permute.xlu0 %706  ;;  %v764_v27 = vpop.permute.xlu1 %763 }
 0x3c7   : > { %v709_v25 = vsel %vm708_vm14, %v705_v8, %v707_v24 }
 0x3c8   : > { %v808_v26 = vpack.c.bf16 %v709_v25, %v697_v23 }
 0x3ca   : > { %v719_v28 = vpop.permute.xlu0 %718  ;;  %1724 = vmatpush3.bf16.msra.mxu0 %v808_v26  ;;  %v776_v34 = vpop.permute.xlu1 %775 }
 0x3cb   : > { %v720_v29 = vsel %vm485_vm2, %v717_v10, %v719_v28  ;;  %1725 = vmatprep.subr.bf16.mxu0 %v1950_v7  ;;  %vm819_vm2 = vcmask 785408  }
 0x3cc   : > { %v1898_v32 = vpack.c.bf16 %v658_v57, %v720_v29 }
 0x3ce   : > { %v766_v30 = vpop.permute.xlu0 %765  ;;  %1899 = vmatpush3.bf16.msk.msra.mxu0 %vm2146_vm7, %v1898_v32  ;;  %v787_v39 = vpop.permute.xlu1 %786 }
 0x3cf   : > { %v768_v33 = vsel %vm767_vm15, %v764_v27, %v766_v30  ;;  %1727 = vmatprep.subr.bf16.mxu0 %v1950_v7 }
 0x3d0   : > { %v811_v38 = vpack.c.bf16 %v768_v33, %v756_v22 }
 0x3d2   : > { %v778_v36 = vpop.permute.xlu0 %777  ;;  %1728 = vmatpush3.bf16.msra.mxu0 %v810_v35 }
 0x3d3   : > { %v779_v37 = vsel %vm601_vm11, %v776_v34, %v778_v36  ;;  %1729 = vmatprep.subr.bf16.mxu0 %v1950_v7 }
 0x3d6   : > { %v789_v40 = vpop.permute.xlu0 %788  ;;  %1730 = vmatpush3.bf16.msra.mxu0 %v811_v38 }
 0x3d7   : > { %v791_v31 = vsel %vm790_vm1, %v787_v39, %v789_v40  ;;  %1731 = vmatprep.subr.bf16.mxu0 %v1950_v7 }
 0x3d8   : > { %v812_v41 = vpack.c.bf16 %v791_v31, %v779_v37 }
 0x3da   : > { %1732 = vmatpush3.bf16.msra.mxu0 %v812_v41 }
 0x3dd   : > { %1734 = vmatmul.mubr.msk.bf16.vlgmr.msra.gmra.mrb[0].mxu0 %vm819_vm2, %v794_v42 }
 0x3df   : > { %v817_v43 = vpop.permute.xlu1 %816 }
 0x4b0   : > { %v857_v44 = vpop.f32.mrb[0].mxu0 }
 0x4b1   : > { %v858_v45 = vadd.f32 %v857_v44, %v817_v43  ;;  %v1735_v46 = vpop.f32.mrb[1].mxu0 }
 0x4b2   : > { %v860_v47 = vpop.f32.mrb[2].mxu0 }
 0x4b3   : > { %v863_v48 = vmax.f32 %v858_v45, 0.0  ;;  %v1736_v49 = vpop.f32.mrb[3].mxu0 }
 0x4b5   : > { %864 = vst [vmem:[%s2119_s4] sm:$0xff] %v863_v48 }
 0x4b6 PF: > { %p1677_p8 = scmp.ne.s32.totalorder %s1931_s27, 1 }
 0x4b7   : > { %v873_v7 = vsel (!%p1677_p8), %vm454_vm0, %v451_v3, -inf  ;;  %v1965_v50 = vmov (!%p1677_p8), -inf   ;;  %v1966_v52 = vmov (!%p1677_p8), 0.0   ;;  %s1967_s26 = smov (!%p1677_p8), 127   ;;  %s1968_s13 = smov (!%p1677_p8), 126   ;;  %vm884_vm3 = vcmask (!%p1677_p8), 1039360  }
 0x4b8   : > { %868 = sbr.rel (%p1677_p8) target bundleno = 2426 (0x97a), region = 56  ;;  %v1857_v51 = vpack.i.bf16 (!%p1677_p8), %v1965_v50, %v873_v7  ;;  %1737 = vmatprep.subr.bf16.mxu1 (!%p1677_p8), %v1966_v52  ;;  %v1862_v53 = vpack.i.bf16 (!%p1677_p8), %v873_v7, %v1965_v50  ;;  %s1969_s14 = smov (!%p1677_p8), 1   ;;  %vm895_vm4 = vcmask (!%p1677_p8), 7168   ;;  %vm903_vm5 = vcmask (!%p1677_p8), 1031168   ;;  %v950_v16 = vld [vmem:[%s2088_s24] sm:$0xff] (!%p1677_p8) }
 0x4b9   : > { %s1970_s27 = smov (!%p1677_p8), 2   ;;  %vm911_vm6 = vcmask (!%p1677_p8), 15360   ;;  %vm1971_vm7 = vmmov (!%p1677_p8), 0   ;;  %s1972_s1 = smov (!%p1677_p8), 123   ;;  %v1974_v15 = vmov (!%p1677_p8), 0   ;;  %vm940_vm8 = vcmask (!%p1677_p8), 1006592  }
 0x4ba   : > { %1858 = vrot.lane.b32.xlu0 (!%p1677_p8), %v1857_v51, %s1967_s26  ;;  %1868 = vrot.lane.b32.xlu1 (!%p1677_p8), %v1857_v51, %s1968_s13  ;;  %s1973_s2 = smov (!%p1677_p8), 5   ;;  %vm928_vm9 = vcmask (!%p1677_p8), 39936   ;;  %vm1975_vm10 = vmmov (!%p1677_p8), 1   ;;  %vm960_vm12 = vcmask (!%p1677_p8), 1043456   ;;  %v944_v29 = vld [vmem:[%s2081_s20] sm:$0xf] (!%p1677_p8) }
 0x4bb   : > { %1741 = vmatprep.mubr.msk.bf16.mxu1 (!%p1677_p8), %vm1971_vm7, %v1966_v52  ;;  %1887 = vset.pattern.permute.xlu0 (!%p1677_p8), %v1974_v15  ;;  %vm2251_vm11 = vmpackc.low (!%p1677_p8), %vm454_vm0, %vm1975_vm10  ;;  %vm956_vm13 = vcmask (!%p1677_p8), 195584   ;;  %s1976_s24 = smov (!%p1677_p8), 9   ;;  %s1977_s20 = smov (!%p1677_p8), 119   ;;  %v1037_v38 = vld [vmem:[%s2099_s15] sm:$0xff] (!%p1677_p8)  ;;  %vm1015_vm14 = vcmask (!%p1677_p8), 72704   ;;  %vm1027_vm15 = vcmask (!%p1677_p8), 973824  }
 0x4bc   : > { %1415 = vmatprep.subr.bf16.mxu0 (!%p1677_p8), %v1974_v15  ;;  %1888 = vset.pattern.permute.xlu1 (!%p1677_p8), %v1974_v15  ;;  %s1978_s28 = smov (!%p1677_p8), 11   ;;  %s1979_s12 = smov (!%p1677_p8), 10   ;;  %v1031_v47 = vld [vmem:[%s2093_s11] sm:$0xf] (!%p1677_p8)  ;;  %vm1100_vm1 = vcmask (!%p1677_p8), 89088   ;;  %vm1112_vm2 = vcmask (!%p1677_p8), 80896  }
 0x4bd   : > { %s1980_s15 = smov (!%p1677_p8), 125   ;;  %s1981_s21 = smov (!%p1677_p8), 8   ;;  %vm1135_vm10 = vcmask (!%p1677_p8), 64512  }
 0x4be   : > { %1863 = vrot.lane.b32.xlu0 (!%p1677_p8), %v1862_v53, %s1969_s14  ;;  %1873 = vrot.lane.b32.xlu1 (!%p1677_p8), %v1862_v53, %s1970_s27  ;;  %s1982_s18 = smov (!%p1677_p8), 124   ;;  %s1983_s16 = smov (!%p1677_p8), 7  }
 0x4bf   : > { %s1984_s22 = smov 6   ;;  %s1985_s23 = smov 4  }
 0x4c0   : > { %s1986_s25 = smov 3   ;;  %s1987_s17 = smov 122  }
 0x4c1   : > { %s1989_s11 = smov 120  }
 0x52c   : > { %v1859_v2 = vpop.permute.xlu0 %1858  ;;  %v1869_v3 = vpop.permute.xlu1 %1868 }
 0x52d   : > { %v1861_v54 = vunpack.i.h.bf16 %v1859_v2  ;;  %v1860_v55 = vunpack.i.l.bf16 %v1859_v2  ;;  %v1871_v57 = vunpack.i.h.bf16 %v1869_v3  ;;  %v1870_v58 = vunpack.i.l.bf16 %v1869_v3  ;;  %v2343_v3 = vld [vmem:[%s2104_s19] sm:$0xff] }
 0x52f   : > { %v885_v56 = vsel %vm884_vm3, %v1860_v55, %v1861_v54  ;;  %v904_v8 = vsel %vm903_vm5, %v1870_v58, %v1871_v57  ;;  %v1681_v55 = vcombine.high %v2343_v3, %v2343_v3 }
 0x530   : > { %v1864_v59 = vpop.permute.xlu0 %1863  ;;  %v1874_v60 = vpop.permute.xlu1 %1873  ;;  %v887_v4 = vmax.f32 %v873_v7, %v885_v56  ;;  %v1399_v56 = vld [vmem:[%s2109_s0] sm:$0xff] }
 0x531   : > { %v1866_v61 = vunpack.i.h.bf16 %v1864_v59  ;;  %v1865_v62 = vunpack.i.l.bf16 %v1864_v59  ;;  %v1876_v63 = vunpack.i.h.bf16 %v1874_v60  ;;  %v1875_v0 = vunpack.i.l.bf16 %v1874_v60 }
 0x533   : > { %v896_v5 = vsel %vm895_vm4, %v1865_v62, %v1866_v61  ;;  %v912_v9 = vsel %vm911_vm6, %v1875_v0, %v1876_v63 }
 0x534   : > { %v898_v6 = vmax.f32 %v887_v4, %v896_v5 }
 0x536   : > { %v906_v10 = vmax.f32 %v898_v6, %v904_v8 }
 0x538   : > { %v914_v11 = vmax.f32 %v906_v10, %v912_v9 }
 0x53a   : > { %v917_v12 = vsel %vm454_vm0, %v914_v11, 0.0 }
 0x53b   : > { %v1882_v13 = vpack.i.bf16 %v1966_v52, %v917_v12  ;;  %v1877_v14 = vpack.i.bf16 %v917_v12, %v1966_v52 }
 0x53d   : > { %1883 = vrot.lane.b32.xlu1 %v1882_v13, %s1972_s1  ;;  %1878 = vrot.lane.b32.xlu0 %v1877_v14, %s1973_s2 }
 0x541   : > { %953 = vperm.xlu0 %1887, %v950_v16   ;;  %1011 = vrot.lane.b32.xlu1 %v1966_v52, %s1976_s24 }
 0x5af   : > { %v1884_v17 = vpop.permute.xlu1 %1883  ;;  %v1879_v18 = vpop.permute.xlu0 %1878 }
 0x5b0   : > { %v1886_v19 = vunpack.i.h.bf16 %v1884_v17  ;;  %v1885_v20 = vunpack.i.l.bf16 %v1884_v17  ;;  %v1881_v21 = vunpack.i.h.bf16 %v1879_v18  ;;  %v1880_v22 = vunpack.i.l.bf16 %v1879_v18 }
 0x5b2   : > { %v941_v23 = vsel %vm940_vm8, %v1885_v20, %v1886_v19  ;;  %v929_v24 = vsel %vm928_vm9, %v1880_v22, %v1881_v21 }
 0x5b3   : > { %v949_v25 = vpack.c.bf16 %v941_v23, %v941_v23  ;;  %v1901_v27 = vpack.c.bf16 %v914_v11, %v929_v24  ;;  %v1012_v39 = vpop.permute.xlu1 %1011 }
 0x5b5   : > { %1902 = vmatpush3.bf16.msk.msra.mxu1 %vm2251_vm11, %v1901_v27  ;;  %v962_v28 = vsel %vm960_vm12, %v949_v25, 0 }
 0x5b6   : > { %1739 = vmatprep.subr.bf16.mxu1 %v1966_v52 }
 0x5b9   : > { %1740 = vmatpush3.bf16.msra.mxu1 %v962_v28 }
 0x5ba   : > { %1745 = vmatprep.subr.bf16.mxu1 %v1966_v52 }
 0x5bc   : > { %1742 = vmatmul.mubr.msk.bf16.vlgmr.msra.gmra.mrb[0].mxu1 %vm956_vm13, %v944_v29 }
 0x5bd   : > { %1749 = vmatprep.mubr.msk.bf16.mxu1 %vm1971_vm7, %v1966_v52  ;;  %vm1252_vm7 = vcmask 1022976  }
 0x5c0   : > { %v954_v30 = vpop.permute.xlu0 %953 }
 0x68f   : > { %v998_v32 = vpop.f32.mrb[0].mxu1 }
 0x690   : > { %v999_v33 = vadd.f32 %v998_v32, %v954_v30  ;;  %v1743_v34 = vpop.f32.mrb[1].mxu1 }
 0x691   : > { %v1001_v35 = vpop.f32.mrb[2].mxu1 }
 0x692   : > { %v1004_v36 = vsel %vm454_vm0, %v999_v33, 0.0  ;;  %v1744_v37 = vpop.f32.mrb[3].mxu1 }
 0x693   : > { %1023 = vrot.lane.b32.xlu0 %v1004_v36, %s1977_s20  ;;  %1013 = vrot.lane.b32.xlu1 %v1004_v36, %s1976_s24 }
 0x697   : > { %1040 = vperm.xlu0 %1887, %v1037_v38   ;;  %1025 = vrot.lane.b32.xlu1 %v1966_v52, %s1977_s20 }
 0x69b   : > { %1096 = vrot.lane.b32.xlu1 %v1966_v52, %s1978_s28  ;;  %1228 = vrot.lane.b32.xlu0 %v1966_v52, %s1967_s26 }
 0x69f   : > { %1108 = vrot.lane.b32.xlu1 %v1966_v52, %s1979_s12  ;;  %1239 = vrot.lane.b32.xlu0 %v1966_v52, %s1968_s13 }
 0x6a3   : > { %1120 = vrot.lane.b32.xlu1 %v1966_v52, %s1976_s24  ;;  %1250 = vrot.lane.b32.xlu0 %v1966_v52, %s1980_s15 }
 0x6a7   : > { %1131 = vrot.lane.b32.xlu1 %v1966_v52, %s1981_s21  ;;  %1262 = vrot.lane.b32.xlu0 %v1966_v52, %s1982_s18 }
 0x6ab   : > { %1143 = vrot.lane.b32.xlu1 %v1966_v52, %s1983_s16  ;;  %1274 = vrot.lane.b32.xlu0 %v1966_v52, %s1972_s1 }
 0x6af   : > { %1155 = vrot.lane.b32.xlu1 %v1966_v52, %s1984_s22  ;;  %1285 = vrot.lane.b32.xlu0 %v1966_v52, %s1987_s17 }
 0x6b3   : > { %1167 = vrot.lane.b32.xlu1 %v1966_v52, %s1973_s2 }
 0x6b7   : > { %1178 = vrot.lane.b32.xlu1 %v1966_v52, %s1985_s23 }
 0x6bb   : > { %1190 = vrot.lane.b32.xlu1 %v1966_v52, %s1986_s25 }
 0x6bf   : > { %1202 = vrot.lane.b32.xlu1 %v1966_v52, %s1970_s27 }
 0x6c3   : > { %1213 = vrot.lane.b32.xlu1 %v1966_v52, %s1969_s14 }
 0x705   : > { %v1014_v40 = vpop.permute.xlu1 %1013  ;;  %v1024_v41 = vpop.permute.xlu0 %1023 }
 0x706   : > { %v1016_v31 = vsel %vm1015_vm14, %v1012_v39, %v1014_v40 }
 0x707   : > { %v1904_v43 = vpack.c.bf16 %v999_v33, %v1016_v31 }
 0x709   : > { %v1026_v42 = vpop.permute.xlu1 %1025  ;;  %1905 = vmatpush3.bf16.msk.msra.mxu1 %vm2251_vm11, %v1904_v43 }
 0x70a   : > { %v1028_v44 = vsel %vm1027_vm15, %v1024_v41, %v1026_v42  ;;  %1747 = vmatprep.subr.bf16.mxu1 %v1966_v52 }
 0x70b   : > { %v1036_v45 = vpack.c.bf16 %v1028_v44, %v1028_v44 }
 0x70d   : > { %v1047_v46 = vsel %vm960_vm12, %v1036_v45, 0  ;;  %v1097_v1 = vpop.permute.xlu1 %1096  ;;  %vm1147_vm12 = vcmask 56320  }
 0x70e   : > { %1748 = vmatpush3.bf16.msra.mxu1 %v1047_v46 }
 0x711   : > { %1750 = vmatmul.mubr.msk.bf16.vlgmr.msra.gmra.mrb[4].mxu1 %vm956_vm13, %v1031_v47  ;;  %v1109_v54 = vpop.permute.xlu1 %1108  ;;  %vm1159_vm13 = vcmask 48128  }
 0x715   : > { %v1121_v57 = vpop.permute.xlu1 %1120 }
 0x716   : > { %v1041_v48 = vpop.permute.xlu0 %1040 }
 0x719   : > { %v1132_v58 = vpop.permute.xlu1 %1131 }
 0x71a   : > { %v1229_v60 = vpop.permute.xlu0 %1228 }
 0x71d   : > { %v1144_v59 = vpop.permute.xlu1 %1143 }
 0x71e   : > { %v1240_v62 = vpop.permute.xlu0 %1239 }
 0x721   : > { %v1156_v61 = vpop.permute.xlu1 %1155 }
 0x722   : > { %v1251_v0 = vpop.permute.xlu0 %1250 }
 0x725   : > { %v1168_v63 = vpop.permute.xlu1 %1167 }
 0x726   : > { %v1263_v5 = vpop.permute.xlu0 %1262 }
 0x729   : > { %v1179_v4 = vpop.permute.xlu1 %1178 }
 0x72a   : > { %v1275_v8 = vpop.permute.xlu0 %1274 }
 0x72d   : > { %v1191_v6 = vpop.permute.xlu1 %1190 }
 0x72e   : > { %v1286_v10 = vpop.permute.xlu0 %1285 }
 0x731   : > { %v1203_v9 = vpop.permute.xlu1 %1202 }
 0x735   : > { %v1214_v11 = vpop.permute.xlu1 %1213 }
 0x7e4   : > { %v1083_v49 = vpop.f32.mrb[4].mxu1 }
 0x7e5   : > { %v2314_v7 = vadd.f32 %v1083_v49, %v1041_v48  ;;  %v1751_v50 = vpop.f32.mrb[5].mxu1 }
 0x7e6   : > { %v1086_v51 = vpop.f32.mrb[6].mxu1 }
 0x7e7   : > { %1089 = vst [vmem:[%s2114_s3] sm:$0xff] %v2314_v7  ;;  %v1090_v53 = vsel %vm454_vm0, %v2314_v7, 0.0  ;;  %v1752_v2 = vpop.f32.mrb[7].mxu1  ;;  %s1988_s3 = smov 121   ;;  %vm1411_vm0 = vcmask 523264  }
 0x7e8   : > { %1226 = vrot.lane.b32.xlu1 %v1090_v53, %s1967_s26  ;;  %1098 = vrot.lane.b32.xlu0 %v1090_v53, %s1978_s28  ;;  %s1990_s26 = smov 118  }
 0x7e9   : > { %1682 = vmatprep.mubr.msk.bf16.mxu0 %vm1411_vm0, %v1681_v55  ;;  %vm1358_vm0 = vcmask 949248  }
 0x7ec   : > { %1237 = vrot.lane.b32.xlu1 %v1090_v53, %s1968_s13  ;;  %1110 = vrot.lane.b32.xlu0 %v1090_v53, %s1979_s12  ;;  %s1991_s13 = smov 117  }
 0x7f0   : > { %1248 = vrot.lane.b32.xlu1 %v1090_v53, %s1980_s15  ;;  %1122 = vrot.lane.b32.xlu0 %v1090_v53, %s1976_s24 }
 0x7f4   : > { %1260 = vrot.lane.b32.xlu1 %v1090_v53, %s1982_s18  ;;  %1133 = vrot.lane.b32.xlu0 %v1090_v53, %s1981_s21 }
 0x7f8   : > { %1272 = vrot.lane.b32.xlu1 %v1090_v53, %s1972_s1  ;;  %1145 = vrot.lane.b32.xlu0 %v1090_v53, %s1983_s16  ;;  %s1992_s1 = smov 116  }
 0x7fc   : > { %1283 = vrot.lane.b32.xlu1 %v1090_v53, %s1987_s17  ;;  %1157 = vrot.lane.b32.xlu0 %v1090_v53, %s1984_s22 }
 0x800   : > { %1295 = vrot.lane.b32.xlu1 %v1090_v53, %s1988_s3  ;;  %1169 = vrot.lane.b32.xlu0 %v1090_v53, %s1973_s2 }
 0x804   : > { %1307 = vrot.lane.b32.xlu1 %v1090_v53, %s1989_s11  ;;  %1180 = vrot.lane.b32.xlu0 %v1090_v53, %s1985_s23 }
 0x808   : > { %1319 = vrot.lane.b32.xlu1 %v1090_v53, %s1977_s20  ;;  %1192 = vrot.lane.b32.xlu0 %v1090_v53, %s1986_s25 }
 0x80c   : > { %1330 = vrot.lane.b32.xlu1 %v1090_v53, %s1990_s26  ;;  %1204 = vrot.lane.b32.xlu0 %v1090_v53, %s1970_s27 }
 0x810   : > { %1342 = vrot.lane.b32.xlu1 %v1090_v53, %s1991_s13  ;;  %1215 = vrot.lane.b32.xlu0 %v1090_v53, %s1969_s14 }
 0x814   : > { %1354 = vrot.lane.b32.xlu1 %v1090_v53, %s1992_s1  ;;  %1297 = vrot.lane.b32.xlu0 %v1966_v52, %s1988_s3 }
 0x818   : > { %1309 = vrot.lane.b32.xlu0 %v1966_v52, %s1989_s11  ;;  %1402 = vperm.xlu1 %1888, %v1399_v56  }
 0x81c   : > { %1321 = vrot.lane.b32.xlu0 %v1966_v52, %s1977_s20 }
 0x820   : > { %1332 = vrot.lane.b32.xlu0 %v1966_v52, %s1990_s26 }
 0x824   : > { %1344 = vrot.lane.b32.xlu0 %v1966_v52, %s1991_s13 }
 0x828   : > { %1356 = vrot.lane.b32.xlu0 %v1966_v52, %s1992_s1 }
 0x85a   : > { %v1227_v12 = vpop.permute.xlu1 %1226  ;;  %v1099_v13 = vpop.permute.xlu0 %1098 }
 0x85b   : > { %v2352_v14 = vsel %vm884_vm3, %v1227_v12, %v1229_v60  ;;  %v1101_v52 = vsel %vm1100_vm1, %v1097_v1, %v1099_v13  ;;  %vm1264_vm3 = vcmask 1014784  }
 0x85e   : > { %v1238_v16 = vpop.permute.xlu1 %1237  ;;  %v1111_v17 = vpop.permute.xlu0 %1110 }
 0x85f   : > { %v2355_v18 = vsel %vm903_vm5, %v1238_v16, %v1240_v62  ;;  %v1113_v19 = vsel %vm1112_vm2, %v1109_v54, %v1111_v17  ;;  %vm1287_vm5 = vcmask 998400  }
 0x860   : > { %v1387_v20 = vpack.c.bf16 %v1113_v19, %v1101_v52 }
 0x862   : > { %v1249_v21 = vpop.permute.xlu1 %1248  ;;  %v1123_v22 = vpop.permute.xlu0 %1122  ;;  %1416 = vmatpush1.bf16.msra.mxu0 %v1387_v20 }
 0x863   : > { %v1253_v23 = vsel %vm1252_vm7, %v1249_v21, %v1251_v0  ;;  %v1124_v24 = vsel %vm1015_vm14, %v1121_v57, %v1123_v22  ;;  %1417 = vmatprep.subr.bf16.mxu0 %v1974_v15  ;;  %vm1182_vm14 = vcmask 31744   ;;  %v1393_v57 = vpack.c.bf16 %v2355_v18, %v2352_v14 }
 0x864   : > { %v1680_v14 = vcombine.low %v2343_v3, %v2343_v3 }
 0x866   : > { %v1261_v25 = vpop.permute.xlu1 %1260  ;;  %v1134_v27 = vpop.permute.xlu0 %1133 }
 0x867   : > { %v1265_v28 = vsel %vm1264_vm3, %v1261_v25, %v1263_v5  ;;  %v1136_v29 = vsel %vm1135_vm10, %v1132_v58, %v1134_v27 }
 0x868   : > { %v1388_v30 = vpack.c.bf16 %v1136_v29, %v1124_v24  ;;  %v1394_v60 = vpack.c.bf16 %v1265_v28, %v1253_v23 }
 0x86a   : > { %v1273_v32 = vpop.permute.xlu1 %1272  ;;  %v1146_v33 = vpop.permute.xlu0 %1145  ;;  %1418 = vmatpush1.bf16.msra.mxu0 %v1388_v30 }
 0x86b   : > { %v1276_v34 = vsel %vm940_vm8, %v1273_v32, %v1275_v8  ;;  %v1148_v35 = vsel %vm1147_vm12, %v1144_v59, %v1146_v33  ;;  %1419 = vmatprep.subr.bf16.mxu0 %v1974_v15  ;;  %vm1194_vm8 = vcmask 23552  }
 0x86e   : > { %v1284_v36 = vpop.permute.xlu1 %1283  ;;  %v1158_v37 = vpop.permute.xlu0 %1157 }
 0x86f   : > { %v1288_v38 = vsel %vm1287_vm5, %v1284_v36, %v1286_v10  ;;  %v1160_v39 = vsel %vm1159_vm13, %v1156_v61, %v1158_v37 }
 0x870   : > { %v1389_v40 = vpack.c.bf16 %v1160_v39, %v1148_v35 }
 0x872   : > { %v1170_v31 = vpop.permute.xlu0 %1169  ;;  %1420 = vmatpush1.bf16.msra.mxu0 %v1389_v40  ;;  %v1296_v47 = vpop.permute.xlu1 %1295 }
 0x873   : > { %v1171_v41 = vsel %vm928_vm9, %v1168_v63, %v1170_v31  ;;  %1421 = vmatprep.subr.bf16.mxu0 %v1974_v15  ;;  %vm1299_vm9 = vcmask 990208  }
 0x876   : > { %v1181_v42 = vpop.permute.xlu0 %1180  ;;  %v1308_v51 = vpop.permute.xlu1 %1307 }
 0x877   : > { %v1183_v43 = vsel %vm1182_vm14, %v1179_v4, %v1181_v42 }
 0x878   : > { %v1390_v44 = vpack.c.bf16 %v1183_v43, %v1171_v41 }
 0x87a   : > { %v1193_v45 = vpop.permute.xlu0 %1192  ;;  %1422 = vmatpush1.bf16.msra.mxu0 %v1390_v44  ;;  %v1320_v56 = vpop.permute.xlu1 %1319 }
 0x87b   : > { %v1195_v46 = vsel %vm1194_vm8, %v1191_v6, %v1193_v45  ;;  %1423 = vmatprep.subr.bf16.mxu0 %v1974_v15 }
 0x87e   : > { %v1205_v48 = vpop.permute.xlu0 %1204  ;;  %v1331_v61 = vpop.permute.xlu1 %1330 }
 0x87f   : > { %v1206_v49 = vsel %vm911_vm6, %v1203_v9, %v1205_v48  ;;  %vm1311_vm6 = vcmask 982016  }
 0x880   : > { %v1391_v50 = vpack.c.bf16 %v1206_v49, %v1195_v46 }
 0x882   : > { %v1216_v53 = vpop.permute.xlu0 %1215  ;;  %1424 = vmatpush1.bf16.msra.mxu0 %v1391_v50  ;;  %v1343_v4 = vpop.permute.xlu1 %1342 }
 0x883   : > { %v1217_v2 = vsel %vm895_vm4, %v1214_v11, %v1216_v53  ;;  %1425 = vmatprep.subr.bf16.mxu0 %v1974_v15  ;;  %vm1334_vm4 = vcmask 965632  }
 0x884   : > { %v1907_v54 = vpack.c.bf16 %v2314_v7, %v1217_v2  ;;  %v1395_v7 = vpack.c.bf16 %v1288_v38, %v1276_v34 }
 0x886   : > { %v1298_v1 = vpop.permute.xlu0 %1297  ;;  %1908 = vmatpush1.bf16.msk.msra.mxu0 %vm2251_vm11, %v1907_v54  ;;  %vm1346_vm11 = vcmask 957440   ;;  %v1355_v10 = vpop.permute.xlu1 %1354 }
 0x887   : > { %v1300_v55 = vsel %vm1299_vm9, %v1296_v47, %v1298_v1  ;;  %1427 = vmatprep.subr.bf16.mxu0 %v1974_v15 }
 0x88a   : > { %v1310_v58 = vpop.permute.xlu0 %1309  ;;  %1428 = vmatpush1.bf16.msra.mxu0 %v1393_v57 }
 0x88b   : > { %v1312_v59 = vsel %vm1311_vm6, %v1308_v51, %v1310_v58  ;;  %1429 = vmatprep.subr.bf16.mxu0 %v1974_v15 }
 0x88c   : > { %v1396_v5 = vpack.c.bf16 %v1312_v59, %v1300_v55 }
 0x88e   : > { %v1322_v62 = vpop.permute.xlu0 %1321  ;;  %1430 = vmatpush1.bf16.msra.mxu0 %v1394_v60 }
 0x88f   : > { %v1323_v26 = vsel %vm1027_vm15, %v1320_v56, %v1322_v62  ;;  %1431 = vmatprep.subr.bf16.mxu0 %v1974_v15 }
 0x892   : > { %v1333_v63 = vpop.permute.xlu0 %1332  ;;  %1432 = vmatpush1.bf16.msra.mxu0 %v1395_v7 }
 0x893   : > { %v1335_v0 = vsel %vm1334_vm4, %v1331_v61, %v1333_v63  ;;  %1433 = vmatprep.subr.bf16.mxu0 %v1974_v15 }
 0x894   : > { %v1397_v9 = vpack.c.bf16 %v1335_v0, %v1323_v26 }
 0x896   : > { %v1345_v6 = vpop.permute.xlu0 %1344  ;;  %1434 = vmatpush1.bf16.msra.mxu0 %v1396_v5 }
 0x897   : > { %v1347_v8 = vsel %vm1346_vm11, %v1343_v4, %v1345_v6  ;;  %1435 = vmatprep.subr.bf16.mxu0 %v1974_v15  ;;  %v1403_v52 = vpop.permute.xlu1 %1402 }
 0x89a   : > { %v1357_v11 = vpop.permute.xlu0 %1356  ;;  %1436 = vmatpush1.bf16.msra.mxu0 %v1397_v9 }
 0x89b   : > { %v1359_v12 = vsel %vm1358_vm0, %v1355_v10, %v1357_v11  ;;  %1437 = vmatprep.subr.bf16.mxu0 %v1974_v15 }
 0x89c   : > { %v1398_v13 = vpack.c.bf16 %v1359_v12, %v1347_v8 }
 0x89e   : > { %1438 = vmatpush1.bf16.msra.mxu0 %v1398_v13 }
 0x8a1   : > { %1448 = vmatmul.mubr.bf16.vlgmr.msra.gmra.mrb[0].mxu0 %v1680_v14 }
 0x974   : > { %v1449_v16 = vpop.f32.mrb[0].mxu0 }
 0x975   : > { %v1450_v17 = vadd.f32 %v1449_v16, %v1403_v52  ;;  %v1451_v18 = vpop.f32.mrb[1].mxu0 }
 0x976   : > { %v1452_v19 = vpop.f32.mrb[2].mxu0 }
 0x977   : > { %v1455_v20 = vmax.f32 %v1450_v17, 0.0  ;;  %v1453_v21 = vpop.f32.mrb[3].mxu0 }
 0x979   : > { %1456 = vst [vmem:[%s2119_s4] sm:$0xff] %v1455_v20 }
 0x97a PF: > { %s19_s9 = sadd.s32 1, %s1947_s9   ;;  %s2421_s0 = sld [smem:[#allocation5_spill]] }
 0x97b   : > { %p16_p9 = scmp.ge.s32.totalorder %s19_s9, 6   ;;  %s2422_s27 = smov %s1939_s29 }
 0x97c   : > { %s2423_s28 = smov %s1943_s30  ;;  %s2424_s29 = smov %s2427_s10 }
 0x97d   :  { %18 = sbr.rel (!%p16_p9) target bundleno = 6 (0x6), region = 116 }
 0x980   : > { %s2425_s30 = smov %s2421_s0 }

</bundles_post_ra>
